<compile_context>
chip_gen: v6e
topology: v6e:2x2x1
jax: 0.10.0
libtpu: 0.0.40
codegen_flags: <defaults>
</compile_context>

<pallas_src>
import math
from dataclasses import dataclass

import jax
import jax.numpy as jnp
import numpy as np
from jax import lax
from jax.experimental import pallas as pl
from jax.experimental.pallas import tpu as pltpu


SUB = 8          # sublane rows per inner-loop iteration (one f32 vreg)
MAX_CHUNK = 256  # max sublane rows DMA'd per grid step per quantity


@dataclass
class RpjCfg:
    apply: bool = True
    soft_clamp: float = 50.0
    soft_clamp_min: float = 1.0
    type: str = "dyntanh"
    circle_schedule: bool = True
    start_apply: float = 0.2


def _round_up(x, m):
    return ((x + m - 1) // m) * m


def _make_kernel(*, chunk_p, chunk_l, n_sub_p, n_sub_l, sp, sl, mask_p, mask_l):
    f32 = jnp.float32

    def kernel(w_ref, pose_ref, cam_ref, pp_ref, tp_ref, vp_ref, kp_ref,
               pl3_ref, tl3_ref, vl_ref, gl_ref, out_ref):
        b = pl.program_id(0)
        c = pl.program_id(1)

        # ---- pose / camera scalars (SMEM, scalar unit) ----
        tx = pose_ref[b, 0]; ty = pose_ref[b, 1]; tz = pose_ref[b, 2]
        qw = pose_ref[b, 3]; qx = pose_ref[b, 4]; qy = pose_ref[b, 5]; qz = pose_ref[b, 6]
        r00 = 1.0 - 2.0 * qy * qy - 2.0 * qz * qz
        r01 = 2.0 * qx * qy - 2.0 * qw * qz
        r02 = 2.0 * qz * qx + 2.0 * qw * qy
        r10 = 2.0 * qx * qy + 2.0 * qw * qz
        r11 = 1.0 - 2.0 * qx * qx - 2.0 * qz * qz
        r12 = 2.0 * qy * qz - 2.0 * qw * qx
        r20 = 2.0 * qz * qx - 2.0 * qw * qy
        r21 = 2.0 * qy * qz + 2.0 * qw * qx
        r22 = 1.0 - 2.0 * qx * qx - 2.0 * qy * qy

        # camera type 0 vs 1 (fx==cam[3] for both models).
        # TODO(synk): type-1 index order (fx,fy,cx,cy = cam[3..6]) taken from the
        #             torch module; only type 0 is exercised by the test.
        is_simple = cam_ref[b, 0] == 0.0
        fx = cam_ref[b, 3]
        fy = jnp.where(is_simple, cam_ref[b, 3], cam_ref[b, 4])
        cx0 = jnp.where(is_simple, cam_ref[b, 4], cam_ref[b, 5])
        cy0 = jnp.where(is_simple, cam_ref[b, 5], cam_ref[b, 6])

        inv_w = 1.0 / w_ref[0]   # runtime dyntanh weight; scalar reciprocal once

        sub_rows = (lax.broadcasted_iota(jnp.int32, (SUB, 128), 0)
                    if (mask_p or mask_l) else None)

        # ---------------- point path: one SUB-row vreg tile per iteration -------
        def point_step(i, carry):
            a_loss, a_unc, a_num, a_cnt = carry
            r = pl.multiple_of(i * SUB, SUB)
            pp = pp_ref[0, :, pl.ds(r, SUB), :].astype(f32)   # (4, 8, 128)
            tp = tp_ref[0, :, pl.ds(r, SUB), :].astype(f32)   # (3, 8, 128)
            vp = vp_ref[0, 0, pl.ds(r, SUB), :].astype(f32)   # (8, 128)
            kp = kp_ref[0, :, pl.ds(r, SUB), :].astype(f32)   # (2, 8, 128)

            dp = pp[:3] - tp
            err = jnp.sqrt(jnp.sum(dp * dp, axis=0))
            loss_t = vp * err
            u = vp - 1.0 / (1.0 + 100.0 * jnp.abs(pp[3]))
            unc_t = u * u

            X, Y, Z = pp[0], pp[1], pp[2]
            camx = r00 * X + r01 * Y + r02 * Z + tx
            camy = r10 * X + r11 * Y + r12 * Z + ty
            camz = r20 * X + r21 * Y + r22 * Z + tz
            inv_camz = pl.reciprocal(camz, approx=True)        # EUP, not VALU
            px = fx * camx * inv_camz + cx0
            py = fy * camy * inv_camz + cy0
            rerr = jnp.sqrt((kp[0] - px) ** 2 + (kp[1] - py) ** 2)
            # NOTE: nonzero validPoints mark samples INVALID for reprojection,
            # matching the torch module (valids | depth/repro checks).
            invalid = (vp != 0.0) | (camz < 0.1) | (rerr > 1000.0) | (camz > 1000.0)
            if mask_p:
                in_rows = (c * chunk_p + r + sub_rows) < sp
                invalid = invalid | jnp.logical_not(in_rows)
                loss_t = jnp.where(in_rows, loss_t, 0.0)
                unc_t = jnp.where(in_rows, unc_t, 0.0)
            m = jnp.logical_not(invalid).astype(f32)
            rerr_safe = jnp.where(invalid, 0.0, rerr)
            num_t = jnp.tanh(rerr_safe * inv_w)   # tanh(0)=0, mask mult dropped
            return (a_loss + loss_t, a_unc + unc_t, a_num + num_t, a_cnt + m)

        # ---------------- line path ---------------------------------------------
        def line_step(i, carry):
            a_loss, a_unc, a_num, a_cnt = carry
            r = pl.multiple_of(i * SUB, SUB)
            l3 = pl3_ref[0, :, pl.ds(r, SUB), :].astype(f32)  # (7, 8, 128)
            tl = tl3_ref[0, :, pl.ds(r, SUB), :].astype(f32)  # (6, 8, 128)
            vl = vl_ref[0, 0, pl.ds(r, SUB), :].astype(f32)   # (8, 128)
            gl = gl_ref[0, :, pl.ds(r, SUB), :].astype(f32)   # (4, 8, 128)

            dl = l3[:6] - tl
            err = jnp.sqrt(jnp.sum(dl * dl, axis=0))
            loss_t = vl * err
            u = vl - 1.0 / (1.0 + 100.0 * jnp.abs(l3[6]))
            unc_t = u * u

            sX, sY, sZ = l3[0], l3[1], l3[2]
            eX, eY, eZ = l3[3], l3[4], l3[5]
            scx = r00 * sX + r01 * sY + r02 * sZ + tx
            scy = r10 * sX + r11 * sY + r12 * sZ + ty
            scz = r20 * sX + r21 * sY + r22 * sZ + tz
            ecx = r00 * eX + r01 * eY + r02 * eZ + tx
            ecy = r10 * eX + r11 * eY + r12 * eZ + ty
            ecz = r20 * eX + r21 * eY + r22 * eZ + tz
            inv_scz = pl.reciprocal(scz, approx=True)
            inv_ecz = pl.reciprocal(ecz, approx=True)
            pxs = fx * scx * inv_scz + cx0
            pys = fy * scy * inv_scz + cy0
            pxe = fx * ecx * inv_ecz + cx0
            pye = fy * ecy * inv_ecz + cy0
            ax, ay, bx, by = gl[0], gl[1], gl[2], gl[3]
            abx, aby = bx - ax, by - ay
            inv_mag = lax.rsqrt(abx * abx + aby * aby)         # EUP rsqrt
            d_s = jnp.abs((pxs - ax) * aby - (pys - ay) * abx) * inv_mag
            d_e = jnp.abs((pxe - ax) * aby - (pye - ay) * abx) * inv_mag
            lerr = d_s + d_e
            invalid = ((vl != 0.0) | (scz < 0.1) | (lerr > 1000.0) | (scz > 1000.0)
                       | (ecz < 0.1) | (ecz > 1000.0))
            if mask_l:
                in_rows = (c * chunk_l + r + sub_rows) < sl
                invalid = invalid | jnp.logical_not(in_rows)
                loss_t = jnp.where(in_rows, loss_t, 0.0)
                unc_t = jnp.where(in_rows, unc_t, 0.0)
            m = jnp.logical_not(invalid).astype(f32)
            lerr_safe = jnp.where(invalid, 0.0, lerr)
            num_t = jnp.tanh(lerr_safe * inv_w)
            return (a_loss + loss_t, a_unc + unc_t, a_num + num_t, a_cnt + m)

        zeros = jnp.zeros((SUB, 128), f32)
        init = (zeros, zeros, zeros, zeros)

        def run(body, n):
            return lax.fori_loop(0, n, body, init, unroll=(n <= 8))

        p_loss, p_unc, p_num, p_cnt = run(point_step, n_sub_p)
        l_loss, l_unc, l_num, l_cnt = run(line_step, n_sub_l)

        # eight unmasked, lane-dense (8,128) stores of per-chunk partial sums
        out_ref[0, 0] = p_loss
        out_ref[0, 1] = p_unc
        out_ref[0, 2] = l_loss
        out_ref[0, 3] = l_unc
        out_ref[0, 4] = p_num
        out_ref[0, 5] = p_cnt
        out_ref[0, 6] = l_num
        out_ref[0, 7] = l_cnt

    return kernel


def criterion_point_line(pred, target, iteration=2000000, *, rpj_cfg,
                         total_iterations=2000000, input_dtype=None):
    pred_pts = pred["points3D"]      # (B,4,Np)
    kp = pred["keypoints"]           # (B,2,Np)
    pred_lns = pred["lines3D"]       # (B,7,Nl)
    gl = pred["lines"]               # (B,4,Nl)
    tgt_pts = target["points3D"]     # (B,3,Np)
    vp = target["validPoints"]       # (B,Np)
    tgt_lns = target["lines3D"]      # (B,6,Nl)
    vl = target["validLines"]        # (B,Nl)
    pose = target["pose"]            # (B,7)
    cam = target["camera"]           # (B,7)

    B, _, Np = pred_pts.shape
    Nl = pred_lns.shape[-1]
    # TODO(synk): support Np/Nl not divisible by 128 (needs a lane-level tail mask).
    assert Np % 128 == 0 and Nl % 128 == 0
    Sp, Sl = Np // 128, Nl // 128

    # dyntanh / tanh loss-weight schedule (host side, like the torch module);
    # the weight is fed to the kernel as DATA so changing `iteration` never
    # recompiles the pallas_call.
    if rpj_cfg.type == "tanh":
        loss_weight = float(rpj_cfg.soft_clamp)
    elif rpj_cfg.type == "dyntanh":
        sw = iteration / total_iterations
        if rpj_cfg.circle_schedule:
            sw = 1.0 - math.sqrt(max(0.0, 1.0 - sw ** 2))
        loss_weight = (1.0 - sw) * rpj_cfg.soft_clamp + rpj_cfg.soft_clamp_min
    else:
        # TODO(synk): ReproLoss types 'l1', 'l1+sqrt', 'l1+logl1' not implemented.
        raise NotImplementedError(rpj_cfg.type)
    w_arr = jnp.asarray([loss_weight], jnp.float32)

    # ---- S-dimension tiling (all static) --------------------------------------
    Sp_pad = _round_up(Sp, SUB)
    Sl_pad = _round_up(Sl, SUB)
    ncp0 = pl.cdiv(Sp_pad, MAX_CHUNK)
    ncl0 = pl.cdiv(Sl_pad, MAX_CHUNK)
    chunk_p = min(_round_up(pl.cdiv(Sp_pad, ncp0), SUB), MAX_CHUNK)
    chunk_l = min(_round_up(pl.cdiv(Sl_pad, ncl0), SUB), MAX_CHUNK)
    ncp = pl.cdiv(Sp_pad, chunk_p)
    ncl = pl.cdiv(Sl_pad, chunk_l)
    nc = max(ncp, ncl)
    n_sub_p = chunk_p // SUB
    n_sub_l = chunk_l // SUB
    mask_p = (nc * chunk_p != Sp)   # some processed rows fall beyond the real data
    mask_l = (nc * chunk_l != Sl)

    # Dense lane-major re-layout; pad the sublane-row dim to a multiple of 8 so
    # every block / vreg-tile slice is aligned (pad rows are masked in-kernel).
    # TODO(synk): pass input_dtype=jnp.bfloat16 to halve HBM traffic on v5e/v6e
    #             (validate loss accuracy first); kernel upcasts to f32 inside.
    def prep(x, C, S, S_pad):
        x = x.reshape(B, C, S, 128)
        if input_dtype is not None:
            x = x.astype(input_dtype)
        if S_pad != S:
            x = jnp.pad(x, ((0, 0), (0, 0), (0, S_pad - S), (0, 0)))
        return x

    pp4 = prep(pred_pts, 4, Sp, Sp_pad)
    tp3 = prep(tgt_pts, 3, Sp, Sp_pad)
    vp4 = prep(vp.reshape(B, 1, Np), 1, Sp, Sp_pad)
    kp4 = prep(kp, 2, Sp, Sp_pad)
    pl7 = prep(pred_lns, 7, Sl, Sl_pad)
    tl6 = prep(tgt_lns, 6, Sl, Sl_pad)
    vl4 = prep(vl.reshape(B, 1, Nl), 1, Sl, Sl_pad)
    gl4 = prep(gl, 4, Sl, Sl_pad)

    # Clamp the block index of the smaller quantity on extra chunk steps; its
    # contribution is zeroed by the in-kernel row mask.
    def pt_idx(b, c):
        cc = jnp.minimum(c, ncp - 1) if ncp < nc else c
        return (b, 0, cc, 0)

    def ln_idx(b, c):
        cc = jnp.minimum(c, ncl - 1) if ncl < nc else c
        return (b, 0, cc, 0)

    kernel = _make_kernel(chunk_p=chunk_p, chunk_l=chunk_l,
                          n_sub_p=n_sub_p, n_sub_l=n_sub_l,
                          sp=Sp, sl=Sl, mask_p=mask_p, mask_l=mask_l)

    grid_spec = pltpu.PrefetchScalarGridSpec(
        num_scalar_prefetch=0,
        grid=(B, nc),
        in_specs=[
            pl.BlockSpec(memory_space=pltpu.MemorySpace.SMEM),      # loss weight
            pl.BlockSpec(memory_space=pltpu.MemorySpace.SMEM),      # pose
            pl.BlockSpec(memory_space=pltpu.MemorySpace.SMEM),      # camera
            pl.BlockSpec((1, 4, chunk_p, 128), pt_idx),             # pred points3D
            pl.BlockSpec((1, 3, chunk_p, 128), pt_idx),             # target points3D
            pl.BlockSpec((1, 1, chunk_p, 128), pt_idx),             # validPoints
            pl.BlockSpec((1, 2, chunk_p, 128), pt_idx),             # keypoints
            pl.BlockSpec((1, 7, chunk_l, 128), ln_idx),             # pred lines3D
            pl.BlockSpec((1, 6, chunk_l, 128), ln_idx),             # target lines3D
            pl.BlockSpec((1, 1, chunk_l, 128), ln_idx),             # validLines
            pl.BlockSpec((1, 4, chunk_l, 128), ln_idx),             # gt 2D lines
        ],
        out_specs=pl.BlockSpec((1, 8, SUB, 128),
                               lambda b, c: (b * nc + c, 0, 0, 0)),
    )
    partials = pl.pallas_call(
        kernel,
        grid_spec=grid_spec,
        out_shape=jax.ShapeDtypeStruct((B * nc, 8, SUB, 128), jnp.float32),
        compiler_params=pltpu.CompilerParams(
            dimension_semantics=("parallel", "parallel")),
    )(w_arr, pose, cam, pp4, tp3, vp4, kp4, pl7, tl6, vl4, gl4)

    # ---- tiny epilogue in plain JAX --------------------------------------------
    sums = jnp.sum(partials.reshape(B, nc, 8, SUB, 128), axis=(1, 3, 4))  # (B, 8)
    loss_points = jnp.sum(sums[:, 0]) / B
    uncer_loss_points = jnp.sum(jnp.sqrt(sums[:, 1])) / B
    loss_lines = jnp.sum(sums[:, 2]) / B
    uncer_loss_lines = jnp.sum(jnp.sqrt(sums[:, 3])) / B

    if rpj_cfg.apply:
        w = w_arr[0]
        pnum, pcnt = sums[:, 4], sums[:, 5]
        lnum, lcnt = sums[:, 6], sums[:, 7]
        points_proj_loss = jnp.sum(
            jnp.where(pcnt > 0, w * pnum / jnp.maximum(pcnt, 1.0), 0.0)) / B
        lines_proj_loss = jnp.sum(
            jnp.where(lcnt > 0, w * lnum / jnp.maximum(lcnt, 1.0), 0.0)) / B
    else:
        points_proj_loss = jnp.float32(0.0)
        lines_proj_loss = jnp.float32(0.0)

    total_loss = loss_points + uncer_loss_points + loss_lines + uncer_loss_lines
    if iteration / total_iterations >= rpj_cfg.start_apply:
        total_loss = total_loss + points_proj_loss + lines_proj_loss

    return (total_loss, loss_points, uncer_loss_points, loss_lines,
            uncer_loss_lines, points_proj_loss, lines_proj_loss)


# ---------------- pure-JAX reference (for correctness check only) ----------------
def _reference_forward(pred, target, iteration, rpj_cfg, total_iterations):
    pred_pts = pred["points3D"]; kp = pred["keypoints"]
    pred_lns = pred["lines3D"]; gl = pred["lines"]
    tgt_pts = target["points3D"]; vp = target["validPoints"]
    tgt_lns = target["lines3D"]; vl = target["validLines"]
    pose = target["pose"]; cam = target["camera"]
    B = pred_pts.shape[0]

    err_p = jnp.sqrt(jnp.sum((pred_pts[:, :3] - tgt_pts) ** 2, axis=1))
    loss_points = jnp.sum(vp * err_p) / B
    u_p = vp - 1.0 / (1.0 + 100.0 * jnp.abs(pred_pts[:, 3]))
    uncer_loss_points = jnp.sum(jnp.sqrt(jnp.sum(u_p ** 2, axis=1))) / B
    err_l = jnp.sqrt(jnp.sum((pred_lns[:, :6] - tgt_lns) ** 2, axis=1))
    loss_lines = jnp.sum(vl * err_l) / B
    u_l = vl - 1.0 / (1.0 + 100.0 * jnp.abs(pred_lns[:, 6]))
    uncer_loss_lines = jnp.sum(jnp.sqrt(jnp.sum(u_l ** 2, axis=1))) / B

    if rpj_cfg.type == "tanh":
        w = rpj_cfg.soft_clamp
    else:
        sw = iteration / total_iterations
        if rpj_cfg.circle_schedule:
            sw = 1.0 - math.sqrt(max(0.0, 1.0 - sw ** 2))
        w = (1.0 - sw) * rpj_cfg.soft_clamp + rpj_cfg.soft_clamp_min

    def rotmat(q):
        qw, qx, qy, qz = q[0], q[1], q[2], q[3]
        return jnp.array(
            [[1 - 2*qy*qy - 2*qz*qz, 2*qx*qy - 2*qw*qz, 2*qz*qx + 2*qw*qy],
             [2*qx*qy + 2*qw*qz, 1 - 2*qx*qx - 2*qz*qz, 2*qy*qz - 2*qw*qx],
             [2*qz*qx - 2*qw*qy, 2*qy*qz + 2*qw*qx, 1 - 2*qx*qx - 2*qy*qy]],
            dtype=jnp.float32)

    pproj = jnp.float32(0.0)
    lproj = jnp.float32(0.0)
    for i in range(B):
        R = rotmat(pose[i, 3:]); t = pose[i, :3][:, None]
        fx = fy = cam[i, 3]; cx0 = cam[i, 4]; cy0 = cam[i, 5]   # camera type 0
        prd = R @ pred_pts[i, :3] + t
        px = fx * prd[0] / prd[2] + cx0
        py = fy * prd[1] / prd[2] + cy0
        rerr = jnp.sqrt((kp[i, 0] - px) ** 2 + (kp[i, 1] - py) ** 2)
        inval = (vp[i] != 0) | (prd[2] < 0.1) | (rerr > 1000) | (prd[2] > 1000)
        m = (~inval).astype(jnp.float32); cnt = m.sum()
        num = jnp.sum(m * w * jnp.tanh(jnp.where(inval, 0.0, rerr) / w))
        pproj = pproj + jnp.where(cnt > 0, num / jnp.maximum(cnt, 1.0), 0.0)

        ps = R @ pred_lns[i, :3] + t
        pe = R @ pred_lns[i, 3:6] + t
        pxs = fx * ps[0] / ps[2] + cx0; pys = fy * ps[1] / ps[2] + cy0
        pxe = fx * pe[0] / pe[2] + cx0; pye = fy * pe[1] / pe[2] + cy0
        ax, ay, bx, by = gl[i, 0], gl[i, 1], gl[i, 2], gl[i, 3]
        abx, aby = bx - ax, by - ay
        mag = jnp.sqrt(abx ** 2 + aby ** 2)
        d_s = jnp.abs((pxs - ax) * aby - (pys - ay) * abx) / mag
        d_e = jnp.abs((pxe - ax) * aby - (pye - ay) * abx) / mag
        lerr = d_s + d_e
        invl = ((vl[i] != 0) | (ps[2] < 0.1) | (lerr > 1000) | (ps[2] > 1000)
                | (pe[2] < 0.1) | (pe[2] > 1000))
        ml = (~invl).astype(jnp.float32); cntl = ml.sum()
        numl = jnp.sum(ml * w * jnp.tanh(jnp.where(invl, 0.0, lerr) / w))
        lproj = lproj + jnp.where(cntl > 0, numl / jnp.maximum(cntl, 1.0), 0.0)
    pproj = pproj / B
    lproj = lproj / B
    total = loss_points + uncer_loss_points + loss_lines + uncer_loss_lines
    if iteration / total_iterations >= rpj_cfg.start_apply:
        total = total + pproj + lproj
    return (total, loss_points, uncer_loss_points, loss_lines,
            uncer_loss_lines, pproj, lproj)


if __name__ == "__main__":
    cfg = RpjCfg(apply=True, soft_clamp=50.0, soft_clamp_min=1.0,
                 type="dyntanh", circle_schedule=True, start_apply=0.2)
    B, Np, Nl = 2, 256, 128
    key = jax.random.PRNGKey(0)
    ks = jax.random.split(key, 12)

    pred_pts = jax.random.normal(ks[0], (B, 4, Np), jnp.float32)
    pred_pts = pred_pts.at[:, 2, :].add(4.0)   # put most points in front of camera
    tgt_pts = pred_pts[:, :3, :] + 0.1 * jax.random.normal(ks[1], (B, 3, Np), jnp.float32)
    vp = (jax.random.uniform(ks[2], (B, Np)) < 0.3).astype(jnp.float32)
    kp = jnp.stack(
        [jax.random.uniform(ks[3], (B, Np), minval=0.0, maxval=640.0),
         jax.random.uniform(ks[4], (B, Np), minval=0.0, maxval=480.0)],
        axis=1).astype(jnp.float32)

    pred_lns = jax.random.normal(ks[5], (B, 7, Nl), jnp.float32)
    pred_lns = pred_lns.at[:, 2, :].add(4.0).at[:, 5, :].add(4.0)
    tgt_lns = pred_lns[:, :6, :] + 0.1 * jax.random.normal(ks[6], (B, 6, Nl), jnp.float32)
    vl = (jax.random.uniform(ks[7], (B, Nl)) < 0.3).astype(jnp.float32)
    gl = jnp.stack(
        [jax.random.uniform(ks[8], (B, Nl), minval=0.0, maxval=640.0),
         jax.random.uniform(ks[9], (B, Nl), minval=0.0, maxval=480.0),
         jax.random.uniform(ks[10], (B, Nl), minval=0.0, maxval=640.0),
         jax.random.uniform(ks[11], (B, Nl), minval=0.0, maxval=480.0)],
        axis=1).astype(jnp.float32)

    q = jnp.array([1.0, 0.08, -0.05, 0.02], jnp.float32)
    q = q / jnp.linalg.norm(q)
    pose = jnp.stack(
        [jnp.concatenate([jnp.array([0.2, -0.1, 1.5], jnp.float32), q]),
         jnp.concatenate([jnp.array([-0.3, 0.05, 2.0], jnp.float32), q])], axis=0)
    cam = jnp.tile(jnp.array([[0.0, 0.0, 0.0, 500.0, 320.0, 240.0, 0.0]],
                             jnp.float32), (B, 1))

    pred = {"points3D": pred_pts, "keypoints": kp, "lines3D": pred_lns, "lines": gl}
    target = {"points3D": tgt_pts, "validPoints": vp, "lines3D": tgt_lns,
              "validLines": vl, "pose": pose, "camera": cam}

    iteration, total_iterations = 500000, 2000000
    out = criterion_point_line(pred, target, iteration,
                               rpj_cfg=cfg, total_iterations=total_iterations)
    out = jax.block_until_ready(out)

    ref = _reference_forward(pred, target, iteration, cfg, total_iterations)
    for a, b in zip(out, ref):
        np.testing.assert_allclose(np.asarray(a), np.asarray(b), rtol=1e-3, atol=1e-3)

    print("KERNEL_OK")
</pallas_src>

<mosaic_0001>
module attributes {stable_mosaic.version = 11 : i64} {
  func.func @kernel(%arg0: i32, %arg1: i32, %arg2: memref<1xf32, #tpu.memory_space<smem>>, %arg3: memref<2x7xf32, #tpu.memory_space<smem>>, %arg4: memref<2x7xf32, #tpu.memory_space<smem>>, %arg5: memref<1x4x8x128xf32, #tpu.memory_space<vmem>>, %arg6: memref<1x3x8x128xf32, #tpu.memory_space<vmem>>, %arg7: memref<1x1x8x128xf32, #tpu.memory_space<vmem>>, %arg8: memref<1x2x8x128xf32, #tpu.memory_space<vmem>>, %arg9: memref<1x7x8x128xf32, #tpu.memory_space<vmem>>, %arg10: memref<1x6x8x128xf32, #tpu.memory_space<vmem>>, %arg11: memref<1x1x8x128xf32, #tpu.memory_space<vmem>>, %arg12: memref<1x4x8x128xf32, #tpu.memory_space<vmem>>, %arg13: memref<1x8x8x128xf32, #tpu.memory_space<vmem>>) attributes {dimension_semantics = [#tpu.dimension_semantics<parallel>, #tpu.dimension_semantics<parallel>], iteration_bounds = array<i64: 2, 1>, scalar_prefetch = 0 : i64, scratch_operands = 0 : i64, tpu.core_type = #tpu.core_type<tc>, window_params = [{transform_indices = @transform_0, window_bounds = array<i64: 1>}, {transform_indices = @transform_1, window_bounds = array<i64: 2, 7>}, {transform_indices = @transform_2, window_bounds = array<i64: 2, 7>}, {transform_indices = @transform_3, window_bounds = array<i64: 1, 4, 8, 128>}, {transform_indices = @transform_4, window_bounds = array<i64: 1, 3, 8, 128>}, {transform_indices = @transform_5, window_bounds = array<i64: 1, 1, 8, 128>}, {transform_indices = @transform_6, window_bounds = array<i64: 1, 2, 8, 128>}, {transform_indices = @transform_7, window_bounds = array<i64: 1, 7, 8, 128>}, {transform_indices = @transform_8, window_bounds = array<i64: 1, 6, 8, 128>}, {transform_indices = @transform_9, window_bounds = array<i64: 1, 1, 8, 128>}, {transform_indices = @transform_10, window_bounds = array<i64: 1, 4, 8, 128>}, {transform_indices = @transform_11, window_bounds = array<i64: 1, 8, 8, 128>}]} {
    %0 = arith.index_cast %arg0 : i32 to index
    %c0 = arith.constant 0 : index
    %1 = memref.load %arg3[%0, %c0] : memref<2x7xf32, #tpu.memory_space<smem>>
    %2 = arith.index_cast %arg0 : i32 to index
    %c1 = arith.constant 1 : index
    %3 = memref.load %arg3[%2, %c1] : memref<2x7xf32, #tpu.memory_space<smem>>
    %4 = arith.index_cast %arg0 : i32 to index
    %c2 = arith.constant 2 : index
    %5 = memref.load %arg3[%4, %c2] : memref<2x7xf32, #tpu.memory_space<smem>>
    %6 = arith.index_cast %arg0 : i32 to index
    %c3 = arith.constant 3 : index
    %7 = memref.load %arg3[%6, %c3] : memref<2x7xf32, #tpu.memory_space<smem>>
    %8 = arith.index_cast %arg0 : i32 to index
    %c4 = arith.constant 4 : index
    %9 = memref.load %arg3[%8, %c4] : memref<2x7xf32, #tpu.memory_space<smem>>
    %10 = arith.index_cast %arg0 : i32 to index
    %c5 = arith.constant 5 : index
    %11 = memref.load %arg3[%10, %c5] : memref<2x7xf32, #tpu.memory_space<smem>>
    %12 = arith.index_cast %arg0 : i32 to index
    %c6 = arith.constant 6 : index
    %13 = memref.load %arg3[%12, %c6] : memref<2x7xf32, #tpu.memory_space<smem>>
    %cst = arith.constant 2.000000e+00 : f32
    %14 = arith.mulf %cst, %11 : f32
    %15 = arith.mulf %14, %11 : f32
    %cst_0 = arith.constant 1.000000e+00 : f32
    %16 = arith.subf %cst_0, %15 : f32
    %cst_1 = arith.constant 2.000000e+00 : f32
    %17 = arith.mulf %cst_1, %13 : f32
    %18 = arith.mulf %17, %13 : f32
    %19 = arith.subf %16, %18 : f32
    %cst_2 = arith.constant 2.000000e+00 : f32
    %20 = arith.mulf %cst_2, %9 : f32
    %21 = arith.mulf %20, %11 : f32
    %cst_3 = arith.constant 2.000000e+00 : f32
    %22 = arith.mulf %cst_3, %7 : f32
    %23 = arith.mulf %22, %13 : f32
    %24 = arith.subf %21, %23 : f32
    %cst_4 = arith.constant 2.000000e+00 : f32
    %25 = arith.mulf %cst_4, %13 : f32
    %26 = arith.mulf %25, %9 : f32
    %cst_5 = arith.constant 2.000000e+00 : f32
    %27 = arith.mulf %cst_5, %7 : f32
    %28 = arith.mulf %27, %11 : f32
    %29 = arith.addf %26, %28 : f32
    %cst_6 = arith.constant 2.000000e+00 : f32
    %30 = arith.mulf %cst_6, %9 : f32
    %31 = arith.mulf %30, %11 : f32
    %cst_7 = arith.constant 2.000000e+00 : f32
    %32 = arith.mulf %cst_7, %7 : f32
    %33 = arith.mulf %32, %13 : f32
    %34 = arith.addf %31, %33 : f32
    %cst_8 = arith.constant 2.000000e+00 : f32
    %35 = arith.mulf %cst_8, %9 : f32
    %36 = arith.mulf %35, %9 : f32
    %cst_9 = arith.constant 1.000000e+00 : f32
    %37 = arith.subf %cst_9, %36 : f32
    %cst_10 = arith.constant 2.000000e+00 : f32
    %38 = arith.mulf %cst_10, %13 : f32
    %39 = arith.mulf %38, %13 : f32
    %40 = arith.subf %37, %39 : f32
    %cst_11 = arith.constant 2.000000e+00 : f32
    %41 = arith.mulf %cst_11, %11 : f32
    %42 = arith.mulf %41, %13 : f32
    %cst_12 = arith.constant 2.000000e+00 : f32
    %43 = arith.mulf %cst_12, %7 : f32
    %44 = arith.mulf %43, %9 : f32
    %45 = arith.subf %42, %44 : f32
    %cst_13 = arith.constant 2.000000e+00 : f32
    %46 = arith.mulf %cst_13, %13 : f32
    %47 = arith.mulf %46, %9 : f32
    %cst_14 = arith.constant 2.000000e+00 : f32
    %48 = arith.mulf %cst_14, %7 : f32
    %49 = arith.mulf %48, %11 : f32
    %50 = arith.subf %47, %49 : f32
    %cst_15 = arith.constant 2.000000e+00 : f32
    %51 = arith.mulf %cst_15, %11 : f32
    %52 = arith.mulf %51, %13 : f32
    %cst_16 = arith.constant 2.000000e+00 : f32
    %53 = arith.mulf %cst_16, %7 : f32
    %54 = arith.mulf %53, %9 : f32
    %55 = arith.addf %52, %54 : f32
    %cst_17 = arith.constant 2.000000e+00 : f32
    %56 = arith.mulf %cst_17, %9 : f32
    %57 = arith.mulf %56, %9 : f32
    %cst_18 = arith.constant 1.000000e+00 : f32
    %58 = arith.subf %cst_18, %57 : f32
    %cst_19 = arith.constant 2.000000e+00 : f32
    %59 = arith.mulf %cst_19, %11 : f32
    %60 = arith.mulf %59, %11 : f32
    %61 = arith.subf %58, %60 : f32
    %62 = arith.index_cast %arg0 : i32 to index
    %c0_20 = arith.constant 0 : index
    %63 = memref.load %arg4[%62, %c0_20] : memref<2x7xf32, #tpu.memory_space<smem>>
    %cst_21 = arith.constant 0.000000e+00 : f32
    %64 = arith.cmpf oeq, %63, %cst_21 : f32
    %65 = arith.index_cast %arg0 : i32 to index
    %c3_22 = arith.constant 3 : index
    %66 = memref.load %arg4[%65, %c3_22] : memref<2x7xf32, #tpu.memory_space<smem>>
    %67 = arith.index_cast %arg0 : i32 to index
    %c3_23 = arith.constant 3 : index
    %68 = memref.load %arg4[%67, %c3_23] : memref<2x7xf32, #tpu.memory_space<smem>>
    %69 = arith.index_cast %arg0 : i32 to index
    %c4_24 = arith.constant 4 : index
    %70 = memref.load %arg4[%69, %c4_24] : memref<2x7xf32, #tpu.memory_space<smem>>
    %71 = arith.select %64, %68, %70 : f32
    %72 = arith.index_cast %arg0 : i32 to index
    %c4_25 = arith.constant 4 : index
    %73 = memref.load %arg4[%72, %c4_25] : memref<2x7xf32, #tpu.memory_space<smem>>
    %74 = arith.index_cast %arg0 : i32 to index
    %c5_26 = arith.constant 5 : index
    %75 = memref.load %arg4[%74, %c5_26] : memref<2x7xf32, #tpu.memory_space<smem>>
    %76 = arith.select %64, %73, %75 : f32
    %77 = arith.index_cast %arg0 : i32 to index
    %c5_27 = arith.constant 5 : index
    %78 = memref.load %arg4[%77, %c5_27] : memref<2x7xf32, #tpu.memory_space<smem>>
    %79 = arith.index_cast %arg0 : i32 to index
    %c6_28 = arith.constant 6 : index
    %80 = memref.load %arg4[%79, %c6_28] : memref<2x7xf32, #tpu.memory_space<smem>>
    %81 = arith.select %64, %78, %80 : f32
    %c0_29 = arith.constant 0 : index
    %82 = memref.load %arg2[%c0_29] : memref<1xf32, #tpu.memory_space<smem>>
    %cst_30 = arith.constant 1.000000e+00 : f32
    %83 = arith.divf %cst_30, %82 : f32
    %84 = tpu.iota {dimensions = array<i32: 0>} : vector<8x128xi32>
    %cst_31 = arith.constant 0.000000e+00 : f32
    %85 = vector.broadcast %cst_31 : f32 to vector<8x128xf32>
    %c0_i32 = arith.constant 0 : i32
    %c8_i32 = arith.constant 8 : i32
    %86 = arith.muli %c0_i32, %c8_i32 : i32
    %87 = tpu.assume_multiple %86, 8 : i32
    %c0_32 = arith.constant 0 : index
    %c0_33 = arith.constant 0 : index
    %88 = arith.index_cast %87 : i32 to index
    %c0_34 = arith.constant 0 : index
    %89 = vector.load %arg5[%c0_32, %c0_33, %88, %c0_34] : memref<1x4x8x128xf32, #tpu.memory_space<vmem>>, vector<1x4x8x128xf32>
    %90 = vector.shape_cast %89 : vector<1x4x8x128xf32> to vector<4x8x128xf32>
    %c0_35 = arith.constant 0 : index
    %c0_36 = arith.constant 0 : index
    %91 = arith.index_cast %87 : i32 to index
    %c0_37 = arith.constant 0 : index
    %92 = vector.load %arg6[%c0_35, %c0_36, %91, %c0_37] : memref<1x3x8x128xf32, #tpu.memory_space<vmem>>, vector<1x3x8x128xf32>
    %93 = vector.shape_cast %92 : vector<1x3x8x128xf32> to vector<3x8x128xf32>
    %c0_38 = arith.constant 0 : index
    %c0_39 = arith.constant 0 : index
    %94 = arith.index_cast %87 : i32 to index
    %c0_40 = arith.constant 0 : index
    %95 = vector.load %arg7[%c0_38, %c0_39, %94, %c0_40] : memref<1x1x8x128xf32, #tpu.memory_space<vmem>>, vector<1x1x8x128xf32>
    %96 = vector.shape_cast %95 : vector<1x1x8x128xf32> to vector<8x128xf32>
    %c0_41 = arith.constant 0 : index
    %c0_42 = arith.constant 0 : index
    %97 = arith.index_cast %87 : i32 to index
    %c0_43 = arith.constant 0 : index
    %98 = vector.load %arg8[%c0_41, %c0_42, %97, %c0_43] : memref<1x2x8x128xf32, #tpu.memory_space<vmem>>, vector<1x2x8x128xf32>
    %99 = vector.shape_cast %98 : vector<1x2x8x128xf32> to vector<2x8x128xf32>
    %100 = vector.extract_strided_slice %90 {offsets = [0, 0, 0], sizes = [3, 8, 128], strides = [1, 1, 1]} : vector<4x8x128xf32> to vector<3x8x128xf32>
    %101 = arith.subf %100, %93 : vector<3x8x128xf32>
    %102 = arith.mulf %101, %101 : vector<3x8x128xf32>
    %cst_44 = arith.constant dense<0.000000e+00> : vector<8x128xf32>
    %103 = vector.multi_reduction <add>, %102, %cst_44 [0] : vector<3x8x128xf32> to vector<8x128xf32>
    %104 = math.sqrt %103 : vector<8x128xf32>
    %105 = arith.mulf %96, %104 : vector<8x128xf32>
    %106 = vector.extract_strided_slice %90 {offsets = [3, 0, 0], sizes = [1, 8, 128], strides = [1, 1, 1]} : vector<4x8x128xf32> to vector<1x8x128xf32>
    %107 = vector.shape_cast %106 : vector<1x8x128xf32> to vector<8x128xf32>
    %108 = math.absf %107 : vector<8x128xf32>
    %cst_45 = arith.constant 1.000000e+02 : f32
    %109 = vector.broadcast %cst_45 : f32 to vector<8x128xf32>
    %110 = arith.mulf %109, %108 : vector<8x128xf32>
    %cst_46 = arith.constant 1.000000e+00 : f32
    %111 = vector.broadcast %cst_46 : f32 to vector<8x128xf32>
    %112 = arith.addf %111, %110 : vector<8x128xf32>
    %cst_47 = arith.constant 1.000000e+00 : f32
    %113 = vector.broadcast %cst_47 : f32 to vector<8x128xf32>
    %114 = arith.divf %113, %112 : vector<8x128xf32>
    %115 = arith.subf %96, %114 : vector<8x128xf32>
    %116 = arith.mulf %115, %115 : vector<8x128xf32>
    %117 = vector.extract_strided_slice %90 {offsets = [0, 0, 0], sizes = [1, 8, 128], strides = [1, 1, 1]} : vector<4x8x128xf32> to vector<1x8x128xf32>
    %118 = vector.shape_cast %117 : vector<1x8x128xf32> to vector<8x128xf32>
    %119 = vector.extract_strided_slice %90 {offsets = [1, 0, 0], sizes = [1, 8, 128], strides = [1, 1, 1]} : vector<4x8x128xf32> to vector<1x8x128xf32>
    %120 = vector.shape_cast %119 : vector<1x8x128xf32> to vector<8x128xf32>
    %121 = vector.extract_strided_slice %90 {offsets = [2, 0, 0], sizes = [1, 8, 128], strides = [1, 1, 1]} : vector<4x8x128xf32> to vector<1x8x128xf32>
    %122 = vector.shape_cast %121 : vector<1x8x128xf32> to vector<8x128xf32>
    %123 = vector.broadcast %19 : f32 to vector<8x128xf32>
    %124 = arith.mulf %123, %118 : vector<8x128xf32>
    %125 = vector.broadcast %24 : f32 to vector<8x128xf32>
    %126 = arith.mulf %125, %120 : vector<8x128xf32>
    %127 = arith.addf %124, %126 : vector<8x128xf32>
    %128 = vector.broadcast %29 : f32 to vector<8x128xf32>
    %129 = arith.mulf %128, %122 : vector<8x128xf32>
    %130 = arith.addf %127, %129 : vector<8x128xf32>
    %131 = vector.broadcast %1 : f32 to vector<8x128xf32>
    %132 = arith.addf %130, %131 : vector<8x128xf32>
    %133 = vector.broadcast %34 : f32 to vector<8x128xf32>
    %134 = arith.mulf %133, %118 : vector<8x128xf32>
    %135 = vector.broadcast %40 : f32 to vector<8x128xf32>
    %136 = arith.mulf %135, %120 : vector<8x128xf32>
    %137 = arith.addf %134, %136 : vector<8x128xf32>
    %138 = vector.broadcast %45 : f32 to vector<8x128xf32>
    %139 = arith.mulf %138, %122 : vector<8x128xf32>
    %140 = arith.addf %137, %139 : vector<8x128xf32>
    %141 = vector.broadcast %3 : f32 to vector<8x128xf32>
    %142 = arith.addf %140, %141 : vector<8x128xf32>
    %143 = vector.broadcast %50 : f32 to vector<8x128xf32>
    %144 = arith.mulf %143, %118 : vector<8x128xf32>
    %145 = vector.broadcast %55 : f32 to vector<8x128xf32>
    %146 = arith.mulf %145, %120 : vector<8x128xf32>
    %147 = arith.addf %144, %146 : vector<8x128xf32>
    %148 = vector.broadcast %61 : f32 to vector<8x128xf32>
    %149 = arith.mulf %148, %122 : vector<8x128xf32>
    %150 = arith.addf %147, %149 : vector<8x128xf32>
    %151 = vector.broadcast %5 : f32 to vector<8x128xf32>
    %152 = arith.addf %150, %151 : vector<8x128xf32>
    %153 = tpu.reciprocal %152 {approx = true} : vector<8x128xf32> -> vector<8x128xf32>
    %154 = vector.broadcast %66 : f32 to vector<8x128xf32>
    %155 = arith.mulf %154, %132 : vector<8x128xf32>
    %156 = arith.mulf %155, %153 : vector<8x128xf32>
    %157 = vector.broadcast %76 : f32 to vector<8x128xf32>
    %158 = arith.addf %156, %157 : vector<8x128xf32>
    %159 = vector.broadcast %71 : f32 to vector<8x128xf32>
    %160 = arith.mulf %159, %142 : vector<8x128xf32>
    %161 = arith.mulf %160, %153 : vector<8x128xf32>
    %162 = vector.broadcast %81 : f32 to vector<8x128xf32>
    %163 = arith.addf %161, %162 : vector<8x128xf32>
    %164 = vector.extract_strided_slice %99 {offsets = [0, 0, 0], sizes = [1, 8, 128], strides = [1, 1, 1]} : vector<2x8x128xf32> to vector<1x8x128xf32>
    %165 = vector.shape_cast %164 : vector<1x8x128xf32> to vector<8x128xf32>
    %166 = arith.subf %165, %158 : vector<8x128xf32>
    %167 = arith.mulf %166, %166 : vector<8x128xf32>
    %168 = vector.extract_strided_slice %99 {offsets = [1, 0, 0], sizes = [1, 8, 128], strides = [1, 1, 1]} : vector<2x8x128xf32> to vector<1x8x128xf32>
    %169 = vector.shape_cast %168 : vector<1x8x128xf32> to vector<8x128xf32>
    %170 = arith.subf %169, %163 : vector<8x128xf32>
    %171 = arith.mulf %170, %170 : vector<8x128xf32>
    %172 = arith.addf %167, %171 : vector<8x128xf32>
    %173 = math.sqrt %172 : vector<8x128xf32>
    %cst_48 = arith.constant 0.000000e+00 : f32
    %174 = vector.broadcast %cst_48 : f32 to vector<8x128xf32>
    %175 = arith.cmpf one, %96, %174 : vector<8x128xf32>
    %cst_49 = arith.constant 1.000000e-01 : f32
    %176 = vector.broadcast %cst_49 : f32 to vector<8x128xf32>
    %177 = arith.cmpf olt, %152, %176 : vector<8x128xf32>
    %178 = arith.ori %175, %177 : vector<8x128xi1>
    %cst_50 = arith.constant 1.000000e+03 : f32
    %179 = vector.broadcast %cst_50 : f32 to vector<8x128xf32>
    %180 = arith.cmpf ogt, %173, %179 : vector<8x128xf32>
    %181 = arith.ori %178, %180 : vector<8x128xi1>
    %cst_51 = arith.constant 1.000000e+03 : f32
    %182 = vector.broadcast %cst_51 : f32 to vector<8x128xf32>
    %183 = arith.cmpf ogt, %152, %182 : vector<8x128xf32>
    %184 = arith.ori %181, %183 : vector<8x128xi1>
    %c8_i32_52 = arith.constant 8 : i32
    %185 = arith.muli %arg1, %c8_i32_52 : i32
    %186 = arith.addi %185, %87 : i32
    %187 = vector.broadcast %186 : i32 to vector<8x128xi32>
    %188 = arith.addi %187, %84 : vector<8x128xi32>
    %c2_i32 = arith.constant 2 : i32
    %189 = vector.broadcast %c2_i32 : i32 to vector<8x128xi32>
    %190 = arith.cmpi slt, %188, %189 : vector<8x128xi32>
    %cst_53 = arith.constant dense<true> : vector<8x128xi1>
    %191 = arith.xori %190, %cst_53 : vector<8x128xi1>
    %192 = arith.ori %184, %191 : vector<8x128xi1>
    %cst_54 = arith.constant 0.000000e+00 : f32
    %193 = vector.broadcast %cst_54 : f32 to vector<8x128xf32>
    %194 = arith.select %190, %105, %193 : vector<8x128xi1>, vector<8x128xf32>
    %cst_55 = arith.constant 0.000000e+00 : f32
    %195 = vector.broadcast %cst_55 : f32 to vector<8x128xf32>
    %196 = arith.select %190, %116, %195 : vector<8x128xi1>, vector<8x128xf32>
    %cst_56 = arith.constant dense<true> : vector<8x128xi1>
    %197 = arith.xori %192, %cst_56 : vector<8x128xi1>
    %198 = arith.extui %197 : vector<8x128xi1> to vector<8x128xi32>
    %199 = arith.sitofp %198 : vector<8x128xi32> to vector<8x128xf32>
    %cst_57 = arith.constant 0.000000e+00 : f32
    %200 = vector.broadcast %cst_57 : f32 to vector<8x128xf32>
    %201 = arith.select %192, %200, %173 : vector<8x128xi1>, vector<8x128xf32>
    %202 = vector.broadcast %83 : f32 to vector<8x128xf32>
    %203 = arith.mulf %201, %202 : vector<8x128xf32>
    %204 = math.tanh %203 : vector<8x128xf32>
    %205 = arith.addf %85, %194 : vector<8x128xf32>
    %206 = arith.addf %85, %196 : vector<8x128xf32>
    %207 = arith.addf %85, %204 : vector<8x128xf32>
    %208 = arith.addf %85, %199 : vector<8x128xf32>
    %c1_i32 = arith.constant 1 : i32
    %c0_i32_58 = arith.constant 0 : i32
    %c8_i32_59 = arith.constant 8 : i32
    %209 = arith.muli %c0_i32_58, %c8_i32_59 : i32
    %210 = tpu.assume_multiple %209, 8 : i32
    %c0_60 = arith.constant 0 : index
    %c0_61 = arith.constant 0 : index
    %211 = arith.index_cast %210 : i32 to index
    %c0_62 = arith.constant 0 : index
    %212 = vector.load %arg9[%c0_60, %c0_61, %211, %c0_62] : memref<1x7x8x128xf32, #tpu.memory_space<vmem>>, vector<1x7x8x128xf32>
    %213 = vector.shape_cast %212 : vector<1x7x8x128xf32> to vector<7x8x128xf32>
    %c0_63 = arith.constant 0 : index
    %c0_64 = arith.constant 0 : index
    %214 = arith.index_cast %210 : i32 to index
    %c0_65 = arith.constant 0 : index
    %215 = vector.load %arg10[%c0_63, %c0_64, %214, %c0_65] : memref<1x6x8x128xf32, #tpu.memory_space<vmem>>, vector<1x6x8x128xf32>
    %216 = vector.shape_cast %215 : vector<1x6x8x128xf32> to vector<6x8x128xf32>
    %c0_66 = arith.constant 0 : index
    %c0_67 = arith.constant 0 : index
    %217 = arith.index_cast %210 : i32 to index
    %c0_68 = arith.constant 0 : index
    %218 = vector.load %arg11[%c0_66, %c0_67, %217, %c0_68] : memref<1x1x8x128xf32, #tpu.memory_space<vmem>>, vector<1x1x8x128xf32>
    %219 = vector.shape_cast %218 : vector<1x1x8x128xf32> to vector<8x128xf32>
    %c0_69 = arith.constant 0 : index
    %c0_70 = arith.constant 0 : index
    %220 = arith.index_cast %210 : i32 to index
    %c0_71 = arith.constant 0 : index
    %221 = vector.load %arg12[%c0_69, %c0_70, %220, %c0_71] : memref<1x4x8x128xf32, #tpu.memory_space<vmem>>, vector<1x4x8x128xf32>
    %222 = vector.shape_cast %221 : vector<1x4x8x128xf32> to vector<4x8x128xf32>
    %223 = vector.extract_strided_slice %213 {offsets = [0, 0, 0], sizes = [6, 8, 128], strides = [1, 1, 1]} : vector<7x8x128xf32> to vector<6x8x128xf32>
    %224 = arith.subf %223, %216 : vector<6x8x128xf32>
    %225 = arith.mulf %224, %224 : vector<6x8x128xf32>
    %cst_72 = arith.constant dense<0.000000e+00> : vector<8x128xf32>
    %226 = vector.multi_reduction <add>, %225, %cst_72 [0] : vector<6x8x128xf32> to vector<8x128xf32>
    %227 = math.sqrt %226 : vector<8x128xf32>
    %228 = arith.mulf %219, %227 : vector<8x128xf32>
    %229 = vector.extract_strided_slice %213 {offsets = [6, 0, 0], sizes = [1, 8, 128], strides = [1, 1, 1]} : vector<7x8x128xf32> to vector<1x8x128xf32>
    %230 = vector.shape_cast %229 : vector<1x8x128xf32> to vector<8x128xf32>
    %231 = math.absf %230 : vector<8x128xf32>
    %cst_73 = arith.constant 1.000000e+02 : f32
    %232 = vector.broadcast %cst_73 : f32 to vector<8x128xf32>
    %233 = arith.mulf %232, %231 : vector<8x128xf32>
    %cst_74 = arith.constant 1.000000e+00 : f32
    %234 = vector.broadcast %cst_74 : f32 to vector<8x128xf32>
    %235 = arith.addf %234, %233 : vector<8x128xf32>
    %cst_75 = arith.constant 1.000000e+00 : f32
    %236 = vector.broadcast %cst_75 : f32 to vector<8x128xf32>
    %237 = arith.divf %236, %235 : vector<8x128xf32>
    %238 = arith.subf %219, %237 : vector<8x128xf32>
    %239 = arith.mulf %238, %238 : vector<8x128xf32>
    %240 = vector.extract_strided_slice %213 {offsets = [0, 0, 0], sizes = [1, 8, 128], strides = [1, 1, 1]} : vector<7x8x128xf32> to vector<1x8x128xf32>
    %241 = vector.shape_cast %240 : vector<1x8x128xf32> to vector<8x128xf32>
    %242 = vector.extract_strided_slice %213 {offsets = [1, 0, 0], sizes = [1, 8, 128], strides = [1, 1, 1]} : vector<7x8x128xf32> to vector<1x8x128xf32>
    %243 = vector.shape_cast %242 : vector<1x8x128xf32> to vector<8x128xf32>
    %244 = vector.extract_strided_slice %213 {offsets = [2, 0, 0], sizes = [1, 8, 128], strides = [1, 1, 1]} : vector<7x8x128xf32> to vector<1x8x128xf32>
    %245 = vector.shape_cast %244 : vector<1x8x128xf32> to vector<8x128xf32>
    %246 = vector.extract_strided_slice %213 {offsets = [3, 0, 0], sizes = [1, 8, 128], strides = [1, 1, 1]} : vector<7x8x128xf32> to vector<1x8x128xf32>
    %247 = vector.shape_cast %246 : vector<1x8x128xf32> to vector<8x128xf32>
    %248 = vector.extract_strided_slice %213 {offsets = [4, 0, 0], sizes = [1, 8, 128], strides = [1, 1, 1]} : vector<7x8x128xf32> to vector<1x8x128xf32>
    %249 = vector.shape_cast %248 : vector<1x8x128xf32> to vector<8x128xf32>
    %250 = vector.extract_strided_slice %213 {offsets = [5, 0, 0], sizes = [1, 8, 128], strides = [1, 1, 1]} : vector<7x8x128xf32> to vector<1x8x128xf32>
    %251 = vector.shape_cast %250 : vector<1x8x128xf32> to vector<8x128xf32>
    %252 = vector.broadcast %19 : f32 to vector<8x128xf32>
    %253 = arith.mulf %252, %241 : vector<8x128xf32>
    %254 = vector.broadcast %24 : f32 to vector<8x128xf32>
    %255 = arith.mulf %254, %243 : vector<8x128xf32>
    %256 = arith.addf %253, %255 : vector<8x128xf32>
    %257 = vector.broadcast %29 : f32 to vector<8x128xf32>
    %258 = arith.mulf %257, %245 : vector<8x128xf32>
    %259 = arith.addf %256, %258 : vector<8x128xf32>
    %260 = vector.broadcast %1 : f32 to vector<8x128xf32>
    %261 = arith.addf %259, %260 : vector<8x128xf32>
    %262 = vector.broadcast %34 : f32 to vector<8x128xf32>
    %263 = arith.mulf %262, %241 : vector<8x128xf32>
    %264 = vector.broadcast %40 : f32 to vector<8x128xf32>
    %265 = arith.mulf %264, %243 : vector<8x128xf32>
    %266 = arith.addf %263, %265 : vector<8x128xf32>
    %267 = vector.broadcast %45 : f32 to vector<8x128xf32>
    %268 = arith.mulf %267, %245 : vector<8x128xf32>
    %269 = arith.addf %266, %268 : vector<8x128xf32>
    %270 = vector.broadcast %3 : f32 to vector<8x128xf32>
    %271 = arith.addf %269, %270 : vector<8x128xf32>
    %272 = vector.broadcast %50 : f32 to vector<8x128xf32>
    %273 = arith.mulf %272, %241 : vector<8x128xf32>
    %274 = vector.broadcast %55 : f32 to vector<8x128xf32>
    %275 = arith.mulf %274, %243 : vector<8x128xf32>
    %276 = arith.addf %273, %275 : vector<8x128xf32>
    %277 = vector.broadcast %61 : f32 to vector<8x128xf32>
    %278 = arith.mulf %277, %245 : vector<8x128xf32>
    %279 = arith.addf %276, %278 : vector<8x128xf32>
    %280 = vector.broadcast %5 : f32 to vector<8x128xf32>
    %281 = arith.addf %279, %280 : vector<8x128xf32>
    %282 = vector.broadcast %19 : f32 to vector<8x128xf32>
    %283 = arith.mulf %282, %247 : vector<8x128xf32>
    %284 = vector.broadcast %24 : f32 to vector<8x128xf32>
    %285 = arith.mulf %284, %249 : vector<8x128xf32>
    %286 = arith.addf %283, %285 : vector<8x128xf32>
    %287 = vector.broadcast %29 : f32 to vector<8x128xf32>
    %288 = arith.mulf %287, %251 : vector<8x128xf32>
    %289 = arith.addf %286, %288 : vector<8x128xf32>
    %290 = vector.broadcast %1 : f32 to vector<8x128xf32>
    %291 = arith.addf %289, %290 : vector<8x128xf32>
    %292 = vector.broadcast %34 : f32 to vector<8x128xf32>
    %293 = arith.mulf %292, %247 : vector<8x128xf32>
    %294 = vector.broadcast %40 : f32 to vector<8x128xf32>
    %295 = arith.mulf %294, %249 : vector<8x128xf32>
    %296 = arith.addf %293, %295 : vector<8x128xf32>
    %297 = vector.broadcast %45 : f32 to vector<8x128xf32>
    %298 = arith.mulf %297, %251 : vector<8x128xf32>
    %299 = arith.addf %296, %298 : vector<8x128xf32>
    %300 = vector.broadcast %3 : f32 to vector<8x128xf32>
    %301 = arith.addf %299, %300 : vector<8x128xf32>
    %302 = vector.broadcast %50 : f32 to vector<8x128xf32>
    %303 = arith.mulf %302, %247 : vector<8x128xf32>
    %304 = vector.broadcast %55 : f32 to vector<8x128xf32>
    %305 = arith.mulf %304, %249 : vector<8x128xf32>
    %306 = arith.addf %303, %305 : vector<8x128xf32>
    %307 = vector.broadcast %61 : f32 to vector<8x128xf32>
    %308 = arith.mulf %307, %251 : vector<8x128xf32>
    %309 = arith.addf %306, %308 : vector<8x128xf32>
    %310 = vector.broadcast %5 : f32 to vector<8x128xf32>
    %311 = arith.addf %309, %310 : vector<8x128xf32>
    %312 = tpu.reciprocal %281 {approx = true} : vector<8x128xf32> -> vector<8x128xf32>
    %313 = tpu.reciprocal %311 {approx = true} : vector<8x128xf32> -> vector<8x128xf32>
    %314 = vector.broadcast %66 : f32 to vector<8x128xf32>
    %315 = arith.mulf %314, %261 : vector<8x128xf32>
    %316 = arith.mulf %315, %312 : vector<8x128xf32>
    %317 = vector.broadcast %76 : f32 to vector<8x128xf32>
    %318 = arith.addf %316, %317 : vector<8x128xf32>
    %319 = vector.broadcast %71 : f32 to vector<8x128xf32>
    %320 = arith.mulf %319, %271 : vector<8x128xf32>
    %321 = arith.mulf %320, %312 : vector<8x128xf32>
    %322 = vector.broadcast %81 : f32 to vector<8x128xf32>
    %323 = arith.addf %321, %322 : vector<8x128xf32>
    %324 = vector.broadcast %66 : f32 to vector<8x128xf32>
    %325 = arith.mulf %324, %291 : vector<8x128xf32>
    %326 = arith.mulf %325, %313 : vector<8x128xf32>
    %327 = vector.broadcast %76 : f32 to vector<8x128xf32>
    %328 = arith.addf %326, %327 : vector<8x128xf32>
    %329 = vector.broadcast %71 : f32 to vector<8x128xf32>
    %330 = arith.mulf %329, %301 : vector<8x128xf32>
    %331 = arith.mulf %330, %313 : vector<8x128xf32>
    %332 = vector.broadcast %81 : f32 to vector<8x128xf32>
    %333 = arith.addf %331, %332 : vector<8x128xf32>
    %334 = vector.extract_strided_slice %222 {offsets = [0, 0, 0], sizes = [1, 8, 128], strides = [1, 1, 1]} : vector<4x8x128xf32> to vector<1x8x128xf32>
    %335 = vector.shape_cast %334 : vector<1x8x128xf32> to vector<8x128xf32>
    %336 = vector.extract_strided_slice %222 {offsets = [1, 0, 0], sizes = [1, 8, 128], strides = [1, 1, 1]} : vector<4x8x128xf32> to vector<1x8x128xf32>
    %337 = vector.shape_cast %336 : vector<1x8x128xf32> to vector<8x128xf32>
    %338 = vector.extract_strided_slice %222 {offsets = [2, 0, 0], sizes = [1, 8, 128], strides = [1, 1, 1]} : vector<4x8x128xf32> to vector<1x8x128xf32>
    %339 = vector.shape_cast %338 : vector<1x8x128xf32> to vector<8x128xf32>
    %340 = vector.extract_strided_slice %222 {offsets = [3, 0, 0], sizes = [1, 8, 128], strides = [1, 1, 1]} : vector<4x8x128xf32> to vector<1x8x128xf32>
    %341 = vector.shape_cast %340 : vector<1x8x128xf32> to vector<8x128xf32>
    %342 = arith.subf %339, %335 : vector<8x128xf32>
    %343 = arith.subf %341, %337 : vector<8x128xf32>
    %344 = arith.mulf %342, %342 : vector<8x128xf32>
    %345 = arith.mulf %343, %343 : vector<8x128xf32>
    %346 = arith.addf %344, %345 : vector<8x128xf32>
    %347 = math.rsqrt %346 : vector<8x128xf32>
    %348 = arith.subf %318, %335 : vector<8x128xf32>
    %349 = arith.mulf %348, %343 : vector<8x128xf32>
    %350 = arith.subf %323, %337 : vector<8x128xf32>
    %351 = arith.mulf %350, %342 : vector<8x128xf32>
    %352 = arith.subf %349, %351 : vector<8x128xf32>
    %353 = math.absf %352 : vector<8x128xf32>
    %354 = arith.mulf %353, %347 : vector<8x128xf32>
    %355 = arith.subf %328, %335 : vector<8x128xf32>
    %356 = arith.mulf %355, %343 : vector<8x128xf32>
    %357 = arith.subf %333, %337 : vector<8x128xf32>
    %358 = arith.mulf %357, %342 : vector<8x128xf32>
    %359 = arith.subf %356, %358 : vector<8x128xf32>
    %360 = math.absf %359 : vector<8x128xf32>
    %361 = arith.mulf %360, %347 : vector<8x128xf32>
    %362 = arith.addf %354, %361 : vector<8x128xf32>
    %cst_76 = arith.constant 0.000000e+00 : f32
    %363 = vector.broadcast %cst_76 : f32 to vector<8x128xf32>
    %364 = arith.cmpf one, %219, %363 : vector<8x128xf32>
    %cst_77 = arith.constant 1.000000e-01 : f32
    %365 = vector.broadcast %cst_77 : f32 to vector<8x128xf32>
    %366 = arith.cmpf olt, %281, %365 : vector<8x128xf32>
    %367 = arith.ori %364, %366 : vector<8x128xi1>
    %cst_78 = arith.constant 1.000000e+03 : f32
    %368 = vector.broadcast %cst_78 : f32 to vector<8x128xf32>
    %369 = arith.cmpf ogt, %362, %368 : vector<8x128xf32>
    %370 = arith.ori %367, %369 : vector<8x128xi1>
    %cst_79 = arith.constant 1.000000e+03 : f32
    %371 = vector.broadcast %cst_79 : f32 to vector<8x128xf32>
    %372 = arith.cmpf ogt, %281, %371 : vector<8x128xf32>
    %373 = arith.ori %370, %372 : vector<8x128xi1>
    %cst_80 = arith.constant 1.000000e-01 : f32
    %374 = vector.broadcast %cst_80 : f32 to vector<8x128xf32>
    %375 = arith.cmpf olt, %311, %374 : vector<8x128xf32>
    %376 = arith.ori %373, %375 : vector<8x128xi1>
    %cst_81 = arith.constant 1.000000e+03 : f32
    %377 = vector.broadcast %cst_81 : f32 to vector<8x128xf32>
    %378 = arith.cmpf ogt, %311, %377 : vector<8x128xf32>
    %379 = arith.ori %376, %378 : vector<8x128xi1>
    %c8_i32_82 = arith.constant 8 : i32
    %380 = arith.muli %arg1, %c8_i32_82 : i32
    %381 = arith.addi %380, %210 : i32
    %382 = vector.broadcast %381 : i32 to vector<8x128xi32>
    %383 = arith.addi %382, %84 : vector<8x128xi32>
    %c1_i32_83 = arith.constant 1 : i32
    %384 = vector.broadcast %c1_i32_83 : i32 to vector<8x128xi32>
    %385 = arith.cmpi slt, %383, %384 : vector<8x128xi32>
    %cst_84 = arith.constant dense<true> : vector<8x128xi1>
    %386 = arith.xori %385, %cst_84 : vector<8x128xi1>
    %387 = arith.ori %379, %386 : vector<8x128xi1>
    %cst_85 = arith.constant 0.000000e+00 : f32
    %388 = vector.broadcast %cst_85 : f32 to vector<8x128xf32>
    %389 = arith.select %385, %228, %388 : vector<8x128xi1>, vector<8x128xf32>
    %cst_86 = arith.constant 0.000000e+00 : f32
    %390 = vector.broadcast %cst_86 : f32 to vector<8x128xf32>
    %391 = arith.select %385, %239, %390 : vector<8x128xi1>, vector<8x128xf32>
    %cst_87 = arith.constant dense<true> : vector<8x128xi1>
    %392 = arith.xori %387, %cst_87 : vector<8x128xi1>
    %393 = arith.extui %392 : vector<8x128xi1> to vector<8x128xi32>
    %394 = arith.sitofp %393 : vector<8x128xi32> to vector<8x128xf32>
    %cst_88 = arith.constant 0.000000e+00 : f32
    %395 = vector.broadcast %cst_88 : f32 to vector<8x128xf32>
    %396 = arith.select %387, %395, %362 : vector<8x128xi1>, vector<8x128xf32>
    %397 = vector.broadcast %83 : f32 to vector<8x128xf32>
    %398 = arith.mulf %396, %397 : vector<8x128xf32>
    %399 = math.tanh %398 : vector<8x128xf32>
    %400 = arith.addf %85, %389 : vector<8x128xf32>
    %401 = arith.addf %85, %391 : vector<8x128xf32>
    %402 = arith.addf %85, %399 : vector<8x128xf32>
    %403 = arith.addf %85, %394 : vector<8x128xf32>
    %c1_i32_89 = arith.constant 1 : i32
    %c0_90 = arith.constant 0 : index
    %c0_91 = arith.constant 0 : index
    %c0_92 = arith.constant 0 : index
    %c0_93 = arith.constant 0 : index
    %404 = vector.load %arg13[%c0_90, %c0_91, %c0_92, %c0_93] : memref<1x8x8x128xf32, #tpu.memory_space<vmem>>, vector<1x1x8x128xf32>
    %405 = vector.shape_cast %404 : vector<1x1x8x128xf32> to vector<8x128xf32>
    %406 = vector.shape_cast %205 : vector<8x128xf32> to vector<1x1x8x128xf32>
    tpu.vector_store %arg13[%c0_90, %c0_91, %c0_92, %c0_93], %406 {strides = array<i32>} : memref<1x8x8x128xf32, #tpu.memory_space<vmem>>, vector<1x1x8x128xf32>,
    %c0_94 = arith.constant 0 : index
    %c1_95 = arith.constant 1 : index
    %c0_96 = arith.constant 0 : index
    %c0_97 = arith.constant 0 : index
    %407 = vector.load %arg13[%c0_94, %c1_95, %c0_96, %c0_97] : memref<1x8x8x128xf32, #tpu.memory_space<vmem>>, vector<1x1x8x128xf32>
    %408 = vector.shape_cast %407 : vector<1x1x8x128xf32> to vector<8x128xf32>
    %409 = vector.shape_cast %206 : vector<8x128xf32> to vector<1x1x8x128xf32>
    tpu.vector_store %arg13[%c0_94, %c1_95, %c0_96, %c0_97], %409 {strides = array<i32>} : memref<1x8x8x128xf32, #tpu.memory_space<vmem>>, vector<1x1x8x128xf32>,
    %c0_98 = arith.constant 0 : index
    %c2_99 = arith.constant 2 : index
    %c0_100 = arith.constant 0 : index
    %c0_101 = arith.constant 0 : index
    %410 = vector.load %arg13[%c0_98, %c2_99, %c0_100, %c0_101] : memref<1x8x8x128xf32, #tpu.memory_space<vmem>>, vector<1x1x8x128xf32>
    %411 = vector.shape_cast %410 : vector<1x1x8x128xf32> to vector<8x128xf32>
    %412 = vector.shape_cast %400 : vector<8x128xf32> to vector<1x1x8x128xf32>
    tpu.vector_store %arg13[%c0_98, %c2_99, %c0_100, %c0_101], %412 {strides = array<i32>} : memref<1x8x8x128xf32, #tpu.memory_space<vmem>>, vector<1x1x8x128xf32>,
    %c0_102 = arith.constant 0 : index
    %c3_103 = arith.constant 3 : index
    %c0_104 = arith.constant 0 : index
    %c0_105 = arith.constant 0 : index
    %413 = vector.load %arg13[%c0_102, %c3_103, %c0_104, %c0_105] : memref<1x8x8x128xf32, #tpu.memory_space<vmem>>, vector<1x1x8x128xf32>
    %414 = vector.shape_cast %413 : vector<1x1x8x128xf32> to vector<8x128xf32>
    %415 = vector.shape_cast %401 : vector<8x128xf32> to vector<1x1x8x128xf32>
    tpu.vector_store %arg13[%c0_102, %c3_103, %c0_104, %c0_105], %415 {strides = array<i32>} : memref<1x8x8x128xf32, #tpu.memory_space<vmem>>, vector<1x1x8x128xf32>,
    %c0_106 = arith.constant 0 : index
    %c4_107 = arith.constant 4 : index
    %c0_108 = arith.constant 0 : index
    %c0_109 = arith.constant 0 : index
    %416 = vector.load %arg13[%c0_106, %c4_107, %c0_108, %c0_109] : memref<1x8x8x128xf32, #tpu.memory_space<vmem>>, vector<1x1x8x128xf32>
    %417 = vector.shape_cast %416 : vector<1x1x8x128xf32> to vector<8x128xf32>
    %418 = vector.shape_cast %207 : vector<8x128xf32> to vector<1x1x8x128xf32>
    tpu.vector_store %arg13[%c0_106, %c4_107, %c0_108, %c0_109], %418 {strides = array<i32>} : memref<1x8x8x128xf32, #tpu.memory_space<vmem>>, vector<1x1x8x128xf32>,
    %c0_110 = arith.constant 0 : index
    %c5_111 = arith.constant 5 : index
    %c0_112 = arith.constant 0 : index
    %c0_113 = arith.constant 0 : index
    %419 = vector.load %arg13[%c0_110, %c5_111, %c0_112, %c0_113] : memref<1x8x8x128xf32, #tpu.memory_space<vmem>>, vector<1x1x8x128xf32>
    %420 = vector.shape_cast %419 : vector<1x1x8x128xf32> to vector<8x128xf32>
    %421 = vector.shape_cast %208 : vector<8x128xf32> to vector<1x1x8x128xf32>
    tpu.vector_store %arg13[%c0_110, %c5_111, %c0_112, %c0_113], %421 {strides = array<i32>} : memref<1x8x8x128xf32, #tpu.memory_space<vmem>>, vector<1x1x8x128xf32>,
    %c0_114 = arith.constant 0 : index
    %c6_115 = arith.constant 6 : index
    %c0_116 = arith.constant 0 : index
    %c0_117 = arith.constant 0 : index
    %422 = vector.load %arg13[%c0_114, %c6_115, %c0_116, %c0_117] : memref<1x8x8x128xf32, #tpu.memory_space<vmem>>, vector<1x1x8x128xf32>
    %423 = vector.shape_cast %422 : vector<1x1x8x128xf32> to vector<8x128xf32>
    %424 = vector.shape_cast %402 : vector<8x128xf32> to vector<1x1x8x128xf32>
    tpu.vector_store %arg13[%c0_114, %c6_115, %c0_116, %c0_117], %424 {strides = array<i32>} : memref<1x8x8x128xf32, #tpu.memory_space<vmem>>, vector<1x1x8x128xf32>,
    %c0_118 = arith.constant 0 : index
    %c7 = arith.constant 7 : index
    %c0_119 = arith.constant 0 : index
    %c0_120 = arith.constant 0 : index
    %425 = vector.load %arg13[%c0_118, %c7, %c0_119, %c0_120] : memref<1x8x8x128xf32, #tpu.memory_space<vmem>>, vector<1x1x8x128xf32>
    %426 = vector.shape_cast %425 : vector<1x1x8x128xf32> to vector<8x128xf32>
    %427 = vector.shape_cast %403 : vector<8x128xf32> to vector<1x1x8x128xf32>
    tpu.vector_store %arg13[%c0_118, %c7, %c0_119, %c0_120], %427 {strides = array<i32>} : memref<1x8x8x128xf32, #tpu.memory_space<vmem>>, vector<1x1x8x128xf32>,
    return
  }
  func.func @transform_0(%arg0: i32, %arg1: i32) -> i32 {
    %c0_i32 = arith.constant 0 : i32
    %c0_i32_0 = arith.constant 0 : i32
    return %c0_i32 : i32
  }
  func.func @transform_1(%arg0: i32, %arg1: i32) -> (i32, i32) {
    %c0_i32 = arith.constant 0 : i32
    %c0_i32_0 = arith.constant 0 : i32
    %c0_i32_1 = arith.constant 0 : i32
    return %c0_i32, %c0_i32_0 : i32, i32
  }
  func.func @transform_2(%arg0: i32, %arg1: i32) -> (i32, i32) {
    %c0_i32 = arith.constant 0 : i32
    %c0_i32_0 = arith.constant 0 : i32
    %c0_i32_1 = arith.constant 0 : i32
    return %c0_i32, %c0_i32_0 : i32, i32
  }
  func.func @transform_3(%arg0: i32, %arg1: i32) -> (i32, i32, i32, i32) {
    %c0_i32 = arith.constant 0 : i32
    %c0_i32_0 = arith.constant 0 : i32
    %c0_i32_1 = arith.constant 0 : i32
    return %arg0, %c0_i32, %arg1, %c0_i32_0 : i32, i32, i32, i32
  }
  func.func @transform_4(%arg0: i32, %arg1: i32) -> (i32, i32, i32, i32) {
    %c0_i32 = arith.constant 0 : i32
    %c0_i32_0 = arith.constant 0 : i32
    %c0_i32_1 = arith.constant 0 : i32
    return %arg0, %c0_i32, %arg1, %c0_i32_0 : i32, i32, i32, i32
  }
  func.func @transform_5(%arg0: i32, %arg1: i32) -> (i32, i32, i32, i32) {
    %c0_i32 = arith.constant 0 : i32
    %c0_i32_0 = arith.constant 0 : i32
    %c0_i32_1 = arith.constant 0 : i32
    return %arg0, %c0_i32, %arg1, %c0_i32_0 : i32, i32, i32, i32
  }
  func.func @transform_6(%arg0: i32, %arg1: i32) -> (i32, i32, i32, i32) {
    %c0_i32 = arith.constant 0 : i32
    %c0_i32_0 = arith.constant 0 : i32
    %c0_i32_1 = arith.constant 0 : i32
    return %arg0, %c0_i32, %arg1, %c0_i32_0 : i32, i32, i32, i32
  }
  func.func @transform_7(%arg0: i32, %arg1: i32) -> (i32, i32, i32, i32) {
    %c0_i32 = arith.constant 0 : i32
    %c0_i32_0 = arith.constant 0 : i32
    %c0_i32_1 = arith.constant 0 : i32
    return %arg0, %c0_i32, %arg1, %c0_i32_0 : i32, i32, i32, i32
  }
  func.func @transform_8(%arg0: i32, %arg1: i32) -> (i32, i32, i32, i32) {
    %c0_i32 = arith.constant 0 : i32
    %c0_i32_0 = arith.constant 0 : i32
    %c0_i32_1 = arith.constant 0 : i32
    return %arg0, %c0_i32, %arg1, %c0_i32_0 : i32, i32, i32, i32
  }
  func.func @transform_9(%arg0: i32, %arg1: i32) -> (i32, i32, i32, i32) {
    %c0_i32 = arith.constant 0 : i32
    %c0_i32_0 = arith.constant 0 : i32
    %c0_i32_1 = arith.constant 0 : i32
    return %arg0, %c0_i32, %arg1, %c0_i32_0 : i32, i32, i32, i32
  }
  func.func @transform_10(%arg0: i32, %arg1: i32) -> (i32, i32, i32, i32) {
    %c0_i32 = arith.constant 0 : i32
    %c0_i32_0 = arith.constant 0 : i32
    %c0_i32_1 = arith.constant 0 : i32
    return %arg0, %c0_i32, %arg1, %c0_i32_0 : i32, i32, i32, i32
  }
  func.func @transform_11(%arg0: i32, %arg1: i32) -> (i32, i32, i32, i32) {
    %c1_i32 = arith.constant 1 : i32
    %0 = arith.muli %arg0, %c1_i32 : i32
    %1 = arith.addi %0, %arg1 : i32
    %c0_i32 = arith.constant 0 : i32
    %c0_i32_0 = arith.constant 0 : i32
    %c0_i32_1 = arith.constant 0 : i32
    %c0_i32_2 = arith.constant 0 : i32
    return %1, %c0_i32, %c0_i32_0, %c0_i32_1 : i32, i32, i32, i32
  }
}

</mosaic_0001>

<bundles_post_ra>
// kernel: tpu_custom_call.1
= control target key start
LH: loop header
LB: loop body
LE: loop exit
PB: predicated region body
PF: predicated region fallthrough
CT: control target
= control target key end

     0   :  { %s2641_s0 = inlined_call_operand.<no memory space> [shape: f32[1], index: 0, kind: input, shape index: {}]   ;;  %s2642_s1 = inlined_call_operand.hbm [shape: f32[2,7], index: 1, kind: input, shape index: {}]   ;;  %s2643_s2 = inlined_call_operand.hbm [shape: f32[2,7], index: 2, kind: input, shape index: {}]   ;;  %s2644_s3 = inlined_call_operand.hbm [shape: f32[2,4,8,128], index: 3, kind: input, shape index: {}]   ;;  %s2645_s4 = inlined_call_operand.hbm [shape: f32[2,3,8,128], index: 4, kind: input, shape index: {}]   ;;  %s2646_s5 = inlined_call_operand.hbm [shape: f32[2,1,8,128], index: 5, kind: input, shape index: {}]   ;;  %s2647_s6 = inlined_call_operand.hbm [shape: f32[2,2,8,128], index: 6, kind: input, shape index: {}]   ;;  %s2648_s7 = inlined_call_operand.hbm [shape: f32[2,7,8,128], index: 7, kind: input, shape index: {}]   ;;  %s2649_s8 = inlined_call_operand.hbm [shape: f32[2,6,8,128], index: 8, kind: input, shape index: {}]   ;;  %s2650_s9 = inlined_call_operand.vmem [shape: f32[2,1,8,128], index: 9, kind: input, shape index: {}]   ;;  %s2651_s10 = inlined_call_operand.hbm [shape: f32[2,4,8,128], index: 10, kind: input, shape index: {}]   ;;  %s2652_s11 = inlined_call_operand.hbm [shape: f32[2,8,8,128], index: 11, kind: output, shape index: {}]  }
   0x1   :  { %2675 = sst [smem:[#allocation33_spill]] %s2642_s1 }
   0x2   :  { %2676 = sst [smem:[#allocation34_spill]] %s2643_s2 }
   0x3   :  { %2677 = sst [smem:[#allocation35_spill]] %s2644_s3 }
   0x4   :  { %2678 = sst [smem:[#allocation36_spill]] %s2645_s4 }
   0x5   :  { %2679 = sst [smem:[#allocation37_spill]] %s2646_s5 }
   0x6   :  { %2680 = sst [smem:[#allocation38_spill]] %s2647_s6 }
   0x7   :  { %2681 = sst [smem:[#allocation39_spill]] %s2648_s7 }
   0x8   :  { %2682 = sst [smem:[#allocation40_spill]] %s2649_s8 }
   0x9   :  { %2683 = sst [smem:[#allocation41_spill]] %s2650_s9 }
   0xa   :  { %2684 = sst [smem:[#allocation42_spill]] %s2651_s10 }
   0xb   :  { %2685 = sst [smem:[#allocation43_spill]] %s2652_s11 }
   0xc   :  { %16 = sst [smem:[#allocation2]] %s2641_s0 }
   0xd   :  { %17 = vsyncpa [#allocation6], 0 }
   0xe   :  { %18 = vsyncpa [#allocation8], 0 }
   0xf   :  { %19 = vsyncpa [#allocation4], 0 }
  0x10   :  { %21 = vsyncpa [#allocation4 + $0x1], 0 }
  0x11   :  { %22 = vsyncpa [#allocation11], 0 }
  0x12   :  { %24 = vsyncpa [#allocation11 + $0x1], 0 }
  0x13   :  { %25 = vsyncpa [#allocation14], 0 }
  0x14   :  { %27 = vsyncpa [#allocation14 + $0x1], 0 }
  0x15   :  { %28 = vsyncpa [#allocation17], 0 }
  0x16   :  { %30 = vsyncpa [#allocation17 + $0x1], 0 }
  0x17   :  { %31 = vsyncpa [#allocation5], 0 }
  0x18   :  { %33 = vsyncpa [#allocation5 + $0x1], 0  ;;  %s1926_s19 = smov 0   ;;  %s1928_s20 = smov 0  }
  0x19   :  { %s1930_s21 = smov 0   ;;  %s1932_s22 = smov 0  }
  0x1a   :  { %s1934_s0 = smov 0   ;;  %s1936_s23 = smov 0  }
  0x1b LB: > { %2686 = sst [smem:[#allocation27_spill]] %s1833_s21  ;;  %s51_s24 = sadd.s32 1, %s1841_s0  ;;  %s1845_s23 = sphi %s1936_s23, %s39_s23   ;;  %s1841_s0 = sphi %s1934_s0, %s2743_s0   ;;  %s1837_s22 = sphi %s1932_s22, %s2742_s22   ;;  %s1833_s21 = sphi %s1930_s21, %s2738_s21   ;;  %s1829_s20 = sphi %s1928_s20, %s2741_s20   ;;  %s1825_s19 = sphi %s1926_s19, %s2740_s19  }
  0x1c   : > { %2687 = sst [smem:[#allocation28_spill]] %s1837_s22  ;;  %s123_s25 = sadd.s32 1, %s1833_s21 }
  0x1d   : > { %2688 = sst [smem:[#allocation29_spill]] %s1845_s23  ;;  %p53_p0 = scmp.ge.s32.totalorder %s51_s24, 2 }
  0x1e   : > { %p130_p1 = scmp.ne.s32.totalorder %s1833_s21, %s1829_s20  ;;  %p131_p2 = scmp.eq.s32.totalorder %s1845_s23, 0 }
  0x1f   : > { %s2745_s24 = smov (%p53_p0, %s51_s24), 0  ;;  %p1443_p5 = scmp.lt.s32.totalorder %s1845_s23, 2 }
  0x20   : > { %2689 = sst [smem:[#allocation30_spill]] %s2745_s24  ;;  %p132_p4 = por %p131_p2, %p130_p1 }
  0x21   : > { %s118_s26 = ssub.s32 %s1841_s0, %s2745_s24  ;;  %s1971_s27 = sand.u32 1, %s1833_s21  }
  0x22   : > { %p121_p6 = scmp.eq.s32.totalorder %s118_s26, 0  ;;  %p1973_p7 = pnand %p1443_p5, %p132_p4 }
  0x23   : > { %s1981_s30 = sand.u32 1, %s1845_s23   ;;  %s1373_s12 = smul.u32 24, %s1971_s27 }
  0x24   : > { %s1978_s29 = scalar_select %p121_p6, %s1833_s21, %s123_s25  }
  0x25   : > { %s1374_s13 = smul.u32 384, %s1841_s0  ;;  %s1337_s14 = sshll.u32 %s1971_s27, 4 }
  0x26   : > { %2691 = sst [smem:[#allocation31_spill]] %s1978_s29  ;;  %s431_s18 = scalar_lea.vmem [#allocation10], %s1373_s12 }
  0x27   : > { %s2692_s4 = sld [smem:[#allocation36_spill]]  ;;  %s439_s24 = sshll.u32 %s431_s18, 4  ;;  %s440_s24 = int_to_ptr.vmem [resolvable:$true] %s439_s24 }
  0x28   : > { %s2656_s26 = scalar_lea.sflag [#allocation11], %s1981_s30  ;;  %p1992_p8 = pneg %p1973_p7 }
  0x29   : > { %s1540_s25 = scalar_lea.vmem %s440_s24, 384  ;;  %s1847_s29 = smov [#allocation10]  }
  0x2a   : > { %p1541_p9 = scmp.ne.s32.totalorder %s440_s24, %s1540_s25  ;;  %s1545_s9 = sshll.u32 %s1847_s29, 4  ;;  %s1546_s9 = int_to_ptr.vmem [resolvable:$false] %s1545_s9 }
  0x2b   : > { %s1547_s15 = scalar_lea.vmem %s1546_s9, 768  ;;  %p1548_p12 = scmp.lt.s32.totalorder %s440_s24, %s1546_s9 }
  0x2c   : > { %p1543_p10 = pnand %p1541_p9, %p1992_p8  ;;  %p1549_p13 = scmp.lt.s32.totalorder %s1547_s15, %s1540_s25 }
  0x2d   : > { %s438_s17 = scalar_lea.hbm %s2692_s4, %s1374_s13 }
  0x2e   : > { %p1544_p11 = pneg %p1543_p10  ;;  %p1550_p0 = por %p1549_p13, %p1548_p12 }
  0x30   : > { %p1551_p2 = pnand %p1550_p0, %p1544_p11 }
  0x32   : > { %1554 = shalt.err (!%p1551_p2)
}
  0x33   : > { %s2659_s12 = smov 128   ;;  %s2661_s13 = smov 8  }
  0x34   : > { %1421 = dma.hbm_to_vmem [thread:$0]  (!%p1973_p7), %s438_s17, 384, %s440_s24, %s2656_s26, %s2659_s12, %s2659_s12, %s2661_s13  }
  0x35   : > { %s1370_s29 = sshll.u32 %s1841_s0, 8  ;;  %s472_s16 = scalar_lea.vmem [#allocation13], %s1337_s14 }
  0x36   : > { %s480_s9 = sshll.u32 %s472_s16, 4  ;;  %s2694_s6 = sld [smem:[#allocation38_spill]]  ;;  %s481_s9 = int_to_ptr.vmem [resolvable:$true] %s480_s9 }
  0x37   : > { %s2658_s4 = scalar_lea.sflag [#allocation14], %s1981_s30  ;;  %s1568_s22 = scalar_lea.vmem %s481_s9, 256 }
  0x38   : > { %p1569_p4 = scmp.ne.s32.totalorder %s481_s9, %s1568_s22  ;;  %s1850_s7 = smov [#allocation13]  }
  0x39   : > { %s1573_s10 = sshll.u32 %s1850_s7, 4  ;;  %s1574_s10 = int_to_ptr.vmem [resolvable:$false] %s1573_s10 }
  0x3a   : > { %p1571_p5 = pnand %p1569_p4, %p1992_p8  ;;  %s1575_s5 = scalar_lea.vmem %s1574_s10, 512 }
  0x3b   : > { %p1576_p9 = scmp.lt.s32.totalorder %s481_s9, %s1574_s10  ;;  %p1577_p10 = scmp.lt.s32.totalorder %s1575_s5, %s1568_s22 }
  0x3c   : > { %s479_s15 = scalar_lea.hbm %s2694_s6, %s1370_s29  ;;  %p1572_p6 = pneg %p1571_p5 }
  0x3d   : > { %p1578_p11 = por %p1577_p10, %p1576_p9 }
  0x3f   : > { %p1579_p12 = pnand %p1578_p11, %p1572_p6 }
  0x41   : > { %1582 = shalt.err (!%p1579_p12)
}
  0x42   : > { %1427 = dma.hbm_to_vmem [thread:$0]  (!%p1973_p7), %s479_s15, 256, %s481_s9, %s2658_s4, %s2659_s12, %s2659_s12, %s2661_s13  }
  0x43   : > { %s1377_s7 = smul.u32 48, %s1971_s27  ;;  %s2695_s8 = sld [smem:[#allocation40_spill]] }
  0x44   : > { %s1378_s24 = smul.u32 768, %s1841_s0  ;;  %s2657_s29 = scalar_lea.sflag [#allocation17], %s1981_s30 }
  0x45   : > { %s516_s22 = scalar_lea.vmem [#allocation16], %s1377_s7  ;;  %s1851_s18 = smov [#allocation16]  }
  0x46   : > { %s524_s17 = sshll.u32 %s516_s22, 4  ;;  %s1601_s25 = sshll.u32 %s1851_s18, 4  ;;  %s525_s17 = int_to_ptr.vmem [resolvable:$true] %s524_s17  ;;  %s1602_s25 = int_to_ptr.vmem [resolvable:$false] %s1601_s25 }
  0x47   : > { %s1596_s16 = scalar_lea.vmem %s525_s17, 768  ;;  %s1603_s26 = scalar_lea.vmem %s1602_s25, 1536 }
  0x48   : > { %p1597_p13 = scmp.ne.s32.totalorder %s525_s17, %s1596_s16  ;;  %p1604_p4 = scmp.lt.s32.totalorder %s525_s17, %s1602_s25 }
  0x49   : > { %s523_s5 = scalar_lea.hbm %s2695_s8, %s1378_s24  ;;  %p1605_p5 = scmp.lt.s32.totalorder %s1603_s26, %s1596_s16 }
  0x4a   : > { %p1599_p0 = pnand %p1597_p13, %p1992_p8 }
  0x4b   : > { %p1606_p6 = por %p1605_p5, %p1604_p4 }
  0x4c   : > { %p1600_p2 = pneg %p1599_p0 }
  0x4e   : > { %p1607_p9 = pnand %p1606_p6, %p1600_p2 }
  0x50   : > { %1610 = shalt.err (!%p1607_p9)
}
  0x51   : > { %1433 = dma.hbm_to_vmem [thread:$0]  (!%p1973_p7), %s523_s5, 768, %s525_s17, %s2657_s29, %s2659_s12, %s2659_s12, %s2661_s13  }
  0x52   : > { %s2035_s26 = sadd.s32 4294967295, %s1845_s23   ;;  %s1326_s9 = sadd.s32 4294967294, %s1845_s23  }
  0x53   : > { %p136_p10 = scmp.ne.s32.totalorder %s1829_s20, %s1825_s19  ;;  %p2664_p11 = scmp.eq.s32.totalorder %s2035_s26, 0 }
  0x54   : > { %p358_p12 = scmp.eq.s32.totalorder %s2035_s26, 1  ;;  %p364_p13 = scmp.eq.s32.totalorder %s1326_s9, 1 }
  0x55   : > { %p1327_p0 = scmp.ge.s32.totalorder %s1845_s23, 1  ;;  %p2045_p2 = por %p2664_p11, %p136_p10 }
  0x56   : > { %p2052_p4 = por %p358_p12, %p130_p1  ;;  %p2056_p5 = por %p364_p13, %p136_p10 }
  0x57   : > { %p371_p6 = scmp.lt.s32.totalorder %s1845_s23, 3  ;;  %s2663_s10 = sshll.u32 %s1971_s27, 5 }
  0x58   : > { %s2698_s24 = scalar_select %p2056_p5, 1, 0 }
  0x59   : > { %p2061_p9 = pnand %p1327_p0, %p371_p6  ;;  %s2665_s5 = sshll.u32 %s1841_s0, 9 }
  0x5a   : > { %2699 = sst [smem:[#allocation32_spill]] %s2698_s24  ;;  %s409_s22 = scalar_lea.vmem [#allocation9], %s2663_s10 }
  0x5b   : > { %p1408_p3 = pneg %p2061_p9  ;;  %s417_s17 = sshll.u32 %s409_s22, 4  ;;  %s418_s17 = int_to_ptr.vmem [resolvable:$true] %s417_s17 }
  0x5c   : > { %s2701_s3 = sld [smem:[#allocation35_spill]]  ;;  %s1852_s9 = smov [#allocation3]  }
  0x5d   : > { %p1409_p1 = pnand %p1408_p3, %p2664_p11  ;;  %s2702_s1 = sld [smem:[#allocation33_spill]] }
  0x5e   : > { %s1853_s12 = smov [#allocation7]   ;;  %s2703_s2 = sld [smem:[#allocation34_spill]] }
  0x5f   : > { %s406_s10 = scalar_lea.sflag [#allocation4], %s1971_s27  ;;  %s1646_s22 = scalar_lea.vmem %s418_s17, 512 }
  0x60   : > { %p1647_p10 = scmp.ne.s32.totalorder %s418_s17, %s1646_s22  ;;  %s1854_s8 = smov [#allocation9]  }
  0x61   : > { %s1651_s16 = sshll.u32 %s1854_s8, 4  ;;  %s1652_s16 = int_to_ptr.vmem [resolvable:$false] %s1651_s16 }
  0x62   : > { %s416_s25 = scalar_lea.hbm %s2701_s3, %s2665_s5  ;;  %p1649_p3 = pnand %p1647_p10, %p1992_p8 }
  0x63   : > { %1411 = dma.hbm_to_smem (!%p1409_p1), %s2702_s1, 32, %s1852_s9, [#allocation6]  }
  0x64   : > { %1414 = dma.hbm_to_smem (!%p1409_p1), %s2703_s2, 32, %s1853_s12, [#allocation8]  }
  0x65   : > { %p1650_p12 = pneg %p1649_p3  ;;  %s1653_s18 = scalar_lea.vmem %s1652_s16, 1024 }
  0x66   : > { %p1654_p13 = scmp.lt.s32.totalorder %s418_s17, %s1652_s16  ;;  %p1655_p0 = scmp.lt.s32.totalorder %s1653_s18, %s1646_s22 }
  0x68   : > { %p1656_p6 = por %p1655_p0, %p1654_p13 }
  0x6a   : > { %p1657_p11 = pnand %p1656_p6, %p1650_p12 }
  0x6c   : > { %1660 = shalt.err (!%p1657_p11)
}
  0x6d   : > { %s2704_s4 = smov 8   ;;  %s2705_s6 = smov 128  }
  0x6e   : > { %1418 = dma.hbm_to_vmem [thread:$0]  (!%p1973_p7), %s416_s25, 512, %s418_s17, %s406_s10, %s2705_s6, %s2705_s6, %s2704_s4  }
  0x6f   : > { %s1335_s12 = sshll.u32 %s1971_s27, 3  ;;  %s2706_s13 = sshll.u32 %s1971_s27, 5 }
  0x70   : > { %s548_s8 = scalar_lea.vmem [#allocation18], %s2706_s13  ;;  %s1336_s9 = sshll.u32 %s1841_s0, 7 }
  0x71   : > { %s556_s29 = sshll.u32 %s548_s8, 4  ;;  %s453_s16 = scalar_lea.vmem [#allocation12], %s1335_s12  ;;  %s2114_s29 = int_to_ptr.vmem [resolvable:$true] %s556_s29 }
  0x72   : > { %s461_s22 = sshll.u32 %s453_s16, 4  ;;  %s2707_s1 = sld [smem:[#allocation37_spill]]  ;;  %s462_s22 = int_to_ptr.vmem [resolvable:$true] %s461_s22 }
  0x73   : > { %s1674_s3 = scalar_lea.vmem %s462_s22, 128  ;;  %s1855_s21 = smov [#allocation12]  }
  0x74   : > { %p1675_p11 = scmp.ne.s32.totalorder %s462_s22, %s1674_s3  ;;  %s1679_s23 = sshll.u32 %s1855_s21, 4  ;;  %s1680_s23 = int_to_ptr.vmem [resolvable:$false] %s1679_s23 }
  0x75   : > { %s1681_s10 = scalar_lea.vmem %s1680_s23, 256  ;;  %p1682_p3 = scmp.lt.s32.totalorder %s462_s22, %s1680_s23 }
  0x76   : > { %p1677_p1 = pnand %p1675_p11, %p1992_p8  ;;  %p1683_p12 = scmp.lt.s32.totalorder %s1681_s10, %s1674_s3 }
  0x78   : > { %s459_s2 = scalar_lea.hbm %s2707_s1, %s1336_s9  ;;  %p1678_p10 = pneg %p1677_p1 }
  0x79   : > { %p1684_p13 = por %p1683_p12, %p1682_p3 }
  0x7b   : > { %p1685_p0 = pnand %p1684_p13, %p1678_p10 }
  0x7d   : > { %1688 = shalt.err (!%p1685_p0)
}
  0x7e   : > { %s2708_s5 = scalar_lea.sflag [#allocation11], %s1981_s30  ;;  %s1375_s1 = smul.u32 56, %s1971_s27 }
  0x7f   : > { %1424 = dma.hbm_to_vmem [thread:$0]  (!%p1973_p7), %s459_s2, 128, %s462_s22, %s2708_s5  }
  0x80   : > { %s2709_s17 = sshll.u32 %s1841_s0, 9  ;;  %s2710_s12 = sld [smem:[#allocation42_spill]] }
  0x81   : > { %s1376_s3 = smul.u32 896, %s1841_s0  ;;  %s2711_s9 = sld [smem:[#allocation39_spill]] }
  0x82   : > { %s494_s18 = scalar_lea.vmem [#allocation15], %s1375_s1  ;;  %s1856_s2 = smov [#allocation15]  }
  0x83   : > { %s502_s10 = sshll.u32 %s494_s18, 4  ;;  %s1707_s27 = sshll.u32 %s1856_s2, 4  ;;  %s503_s10 = int_to_ptr.vmem [resolvable:$true] %s502_s10  ;;  %s1708_s27 = int_to_ptr.vmem [resolvable:$false] %s1707_s27 }
  0x84   : > { %s1702_s24 = scalar_lea.vmem %s503_s10, 896  ;;  %s1709_s22 = scalar_lea.vmem %s1708_s27, 1792 }
  0x85   : > { %p1703_p6 = scmp.ne.s32.totalorder %s503_s10, %s1702_s24  ;;  %p1710_p10 = scmp.lt.s32.totalorder %s503_s10, %s1708_s27 }
  0x86   : > { %s2111_s13 = scalar_lea.hbm %s2710_s12, %s2709_s17  ;;  %p1711_p3 = scmp.lt.s32.totalorder %s1709_s22, %s1702_s24 }
  0x87   : > { %s501_s16 = scalar_lea.hbm %s2711_s9, %s1376_s3  ;;  %p1705_p11 = pnand %p1703_p6, %p1992_p8 }
  0x88   : > { %p1712_p12 = por %p1711_p3, %p1710_p10 }
  0x89   : > { %p1706_p1 = pneg %p1705_p11 }
  0x8b   : > { %p1713_p13 = pnand %p1712_p12, %p1706_p1 }
  0x8d   : > { %1716 = shalt.err (!%p1713_p13)
}
  0x8e   : > { %s2712_s5 = scalar_lea.sflag [#allocation14], %s1981_s30  ;;  %s1730_s1 = scalar_lea.vmem %s2114_s29, 512 }
  0x8f   : > { %1430 = dma.hbm_to_vmem [thread:$0]  (!%p1973_p7), %s501_s16, 896, %s503_s10, %s2712_s5, %s2705_s6, %s2705_s6, %s2704_s4  }
  0x90   : > { %p1731_p0 = scmp.ne.s32.totalorder %s2114_s29, %s1730_s1  ;;  %s1857_s24 = smov [#allocation18]  }
  0x91   : > { %s1735_s17 = sshll.u32 %s1857_s24, 4  ;;  %s1736_s17 = int_to_ptr.vmem [resolvable:$false] %s1735_s17 }
  0x92   : > { %p1733_p6 = pnand %p1731_p0, %p1992_p8  ;;  %s1737_s25 = scalar_lea.vmem %s1736_s17, 1024 }
  0x93   : > { %p1738_p1 = scmp.lt.s32.totalorder %s2114_s29, %s1736_s17  ;;  %p1739_p10 = scmp.lt.s32.totalorder %s1737_s25, %s1730_s1 }
  0x94   : > { %p1734_p11 = pneg %p1733_p6 }
  0x95   : > { %p1740_p3 = por %p1739_p10, %p1738_p1 }
  0x97   : > { %p1741_p12 = pnand %p1740_p3, %p1734_p11 }
  0x99   : > { %1744 = shalt.err (!%p1741_p12)
}
  0x9a   : > { %s2713_s21 = scalar_lea.sflag [#allocation17], %s1981_s30  ;;  %568 = sbr.rel (%p2061_p9) target bundleno = 305 (0x131), region = 64 }
  0x9b   : > { %1436 = dma.hbm_to_vmem [thread:$0]  (!%p1973_p7), %s2111_s13, 512, %s2114_s29, %s2713_s21, %s2705_s6, %s2705_s6, %s2704_s4  }
  0x9c   : > { %p2714_p8 = scmp.eq.s32.totalorder (!%p2061_p9), %s2035_s26, 0 }
  0x9f   : > { %1796 = dma.done.wait (%p2714_p8), [#allocation6], 32   ;;  %p2715_p13 = pmov %p2714_p8 }
  0xa0   : > { %p2716_p0 = pmov %p2714_p8 }
  0xa1   : > { %1798 = vsyncadd (%p2715_p13), [#allocation6], 4294967264 }
  0xa2   : > { %1800 = dma.done.wait (%p2716_p0), [#allocation8], 32   ;;  %p2717_p6 = pmov %p2716_p0 }
  0xa3   : > { %s2153_s11 = sand.u32 1, %s1829_s20  }
  0xa4   : > { %1802 = vsyncadd (%p2717_p6), [#allocation8], 4294967264  ;;  %s1348_s28 = sshll.u32 %s2153_s11, 5  ;;  %s579_s30 = scalar_lea.sflag [#allocation4], %s2153_s11 }
  0xa5   : > { %s2157_s14 = scalar_lea.vmem [#allocation9], %s1348_s28 }
  0xa6   : > { %1804 = dma.done.wait (%p2045_p2), %s579_s30, 512  }
  0xa7   : > { %1806 = vsyncadd (%p2045_p2), %s579_s30, 4294966784  ;;  %s587_s4 = sand.u32 1, %s2035_s26   ;;  %s1379_s6 = smul.u32 24, %s2153_s11 }
  0xa8   : > { %s588_s29 = scalar_lea.sflag [#allocation11], %s587_s4 }
  0xa9   : > { %s591_s12 = scalar_lea.vmem [#allocation10], %s1379_s6 }
  0xaa   : > { %1808 = dma.done.wait (%p2045_p2), %s588_s29, 512  }
  0xab   : > { %1810 = vsyncadd (%p2045_p2), %s588_s29, 4294966784  ;;  %s1349_s13 = sshll.u32 %s2153_s11, 3  ;;  %s1350_s3 = sshll.u32 %s2153_s11, 4 }
  0xac   : > { %s2171_s23 = scalar_lea.vmem [#allocation12], %s1349_s13  ;;  %s606_s8 = scalar_lea.sflag [#allocation14], %s587_s4 }
  0xad   : > { %s2173_s9 = scalar_lea.vmem [#allocation13], %s1350_s3 }
  0xae   : > { %1812 = dma.done.wait (%p2045_p2), %s606_s8, 1152  }
  0xaf   : > { %1814 = vsyncadd (%p2045_p2), %s606_s8, 4294966144  ;;  %s1380_s26 = smul.u32 56, %s2153_s11  ;;  %s624_s10 = scalar_lea.sflag [#allocation17], %s587_s4 }
  0xb0   : > { %s1381_s16 = smul.u32 48, %s2153_s11 }
  0xb1   : > { %s2181_s18 = scalar_lea.vmem [#allocation15], %s1380_s26 }
  0xb2   : > { %s2183_s2 = scalar_lea.vmem [#allocation16], %s1381_s16 }
  0xb3   : > { %1816 = dma.done.wait (%p2045_p2), %s624_s10, 1280  }
  0xb4   : > { %1818 = vsyncadd (%p2045_p2), %s624_s10, 4294966016  ;;  %s2189_s27 = scalar_lea.vmem [#allocation18], %s1348_s28 }
  0xb5   : > { %641 = sfence }
  0xb6   : > { %s2718_s22 = sld [smem:[#allocation28_spill]]  ;;  %v2192_v0 = vld [vmem:[%s2157_s14] sm:$0xff]  ;;  %v2195_v1 = vld [vmem:[%s2157_s14 + $0x8] sm:$0xff]  ;;  %v777_v2 = vld [vmem:[%s2157_s14 + $0x18] sm:$0xff]  ;;  %v772_v48 = vlaneseq  ;;  %vm1858_vm12 = vmmov 1  }
  0xb7   : > { %v778_v3 = vld [vmem:[%s591_s12] sm:$0xff]  ;;  %v779_v4 = vld [vmem:[%s591_s12 + $0x8] sm:$0xff]  ;;  %v2199_v5 = vld [vmem:[%s2157_s14 + $0x10] sm:$0xff]  ;;  %v800_v10 = vand.u32 2147483647, %v777_v2  ;;  %s768_s26 = sld [smem:[#allocation2]] }
  0xb8   : > { %v780_v6 = vld [vmem:[%s591_s12 + $0x10] sm:$0xff]  ;;  %v784_v7 = vsub.f32 %v2192_v0, %v778_v3  ;;  %v785_v8 = vsub.f32 %v2195_v1, %v779_v4  ;;  %v2208_v15 = vld [vmem:[%s2181_s18] sm:$0xff]  ;;  %v2213_v17 = vld [vmem:[%s2181_s18 + $0x8] sm:$0xff]  ;;  %v2315_v54 = vshrl.u32 %v772_v48, 7 }
  0xb9   : > { %v786_v9 = vsub.f32 %v2199_v5, %v780_v6  ;;  %v801_v14 = vmul.f32 100.0, %v800_v10  ;;  %v2216_v18 = vld [vmem:[%s2181_s18 + $0x10] sm:$0xff]  ;;  %v896_v22 = vld [vmem:[%s2183_s2 + $0x10] sm:$0xff]  ;;  %v897_v23 = vld [vmem:[%s2183_s2 + $0x18] sm:$0xff] }
  0xba   : > { %v787_v11 = vmul.f32 %v784_v7, %v784_v7  ;;  %v788_v12 = vmul.f32 %v785_v8, %v785_v8  ;;  %v894_v19 = vld [vmem:[%s2183_s2] sm:$0xff]  ;;  %v895_v21 = vld [vmem:[%s2183_s2 + $0x8] sm:$0xff]  ;;  %v907_v29 = vsub.f32 %v2216_v18, %v896_v22  ;;  %v2254_v31 = vld [vmem:[%s2181_s18 + $0x20] sm:$0xff]  ;;  %vm871_vm2 = vcmp.lt.s32.totalorder %v2315_v54, 2 }
  0xbb   : > { %v789_v13 = vmul.f32 %v786_v9, %v786_v9  ;;  %v802_v20 = vadd.f32 1.0, %v801_v14  ;;  %v905_v24 = vsub.f32 %v2208_v15, %v894_v19  ;;  %v2236_v26 = vld [vmem:[%s2181_s18 + $0x18] sm:$0xff]  ;;  %v898_v27 = vld [vmem:[%s2183_s2 + $0x20] sm:$0xff]  ;;  %v906_v28 = vsub.f32 %v2213_v17, %v895_v21  ;;  %vm2559_vm13 = vmxor %vm871_vm2, %vm1858_vm12 }
  0xbc   : > { %s2204_s15 = sshll.u32 %s2718_s22, 7  ;;  %p713_p7 = scmp.lt.s32.totalorder %s2718_s22, 1  ;;  %v790_v16 = vadd.f32 %v788_v12, %v787_v11  ;;  %v908_v30 = vsub.f32 %v2236_v26, %v897_v23  ;;  %v893_v32 = vld [vmem:[%s2181_s18 + $0x30] sm:$0xff]  ;;  %v909_v34 = vsub.f32 %v2254_v31, %v898_v27  ;;  %v913_v37 = vmul.f32 %v907_v29, %v907_v29  ;;  %v2265_v38 = vld [vmem:[%s2181_s18 + $0x28] sm:$0xff] }
  0xbd   : > { %s2673_s5 = sadd.s32 3, %s2204_s15  ;;  %s2672_s24 = sadd.s32 4, %s2204_s15  ;;  %1503 = vrcp.f32 %v802_v20  ;;  %v899_v33 = vld [vmem:[%s2183_s2 + $0x28] sm:$0xff]  ;;  %v911_v35 = vmul.f32 %v905_v24, %v905_v24  ;;  %v912_v36 = vmul.f32 %v906_v28, %v906_v28  ;;  %v930_v42 = vand.u32 2147483647, %v893_v32  ;;  %v2318_v55 = vld [vmem:[%s2171_s23] sm:$0xff] }
  0xbe   : > { %s2221_s1 = sld [smem:[#allocation3 + %s2673_s5]]  ;;  %s2671_s25 = sadd.s32 5, %s2204_s15  ;;  %v2233_v25 = vadd.f32 %v790_v16, %v789_v13  ;;  %v910_v39 = vsub.f32 %v2265_v38, %v899_v33  ;;  %v914_v40 = vmul.f32 %v908_v30, %v908_v30  ;;  %v915_v43 = vmul.f32 %v909_v34, %v909_v34  ;;  %v2430_v33 = vld [vmem:[%s2189_s27] sm:$0xff]  ;;  %v903_v34 = vld [vmem:[%s2189_s27 + $0x10] sm:$0xff] }
  0xbf   : > { %s2230_s17 = sld [smem:[#allocation3 + %s2672_s24]]  ;;  %s2670_s28 = sadd.s32 6, %s2204_s15  ;;  %v917_v41 = vadd.f32 %v912_v36, %v911_v35  ;;  %v931_v45 = vmul.f32 100.0, %v930_v42  ;;  %v769_v53 = vstv %s768_s26  ;;  %vm1019_vm5 = vcmp.lt.s32.totalorder %v2315_v54, 1 }
  0xc0   : > { %s2243_s21 = sld [smem:[#allocation3 + %s2671_s25]]  ;;  %1505 = vrsqrt.f32 %v2233_v25  ;;  %s723_s13 = sadd.s32 1, %s2204_s15  ;;  %v916_v46 = vmul.f32 %v910_v39, %v910_v39  ;;  %vm794_vm0 = vcmp.eq.f32.partialorder %v2233_v25, inf  ;;  %v797_v57 = vand.u32 2147483648, %v2233_v25 }
  0xc1   : > { %s2250_s14 = sld [smem:[#allocation3 + %s2670_s28]]  ;;  %v918_v44 = vadd.f32 %v917_v41, %v913_v37  ;;  %s725_s16 = sadd.s32 2, %s2204_s15  ;;  %v932_v49 = vadd.f32 1.0, %v931_v45  ;;  %vm796_vm1 = vcmp.eq.f32.partialorder %v2233_v25, 0.0  ;;  %vm860_vm6 = vcmp.ne.f32.partialorder %v2318_v55, 0.0 }
  0xc2   : > { %s2262_s4 = scalar_select %p713_p7, %s2718_s22, 1 }
  0xc3   : > { %s2272_s29 = sld [smem:[#allocation3 + %s2204_s15]]  ;;  %v919_v47 = vadd.f32 %v918_v44, %v914_v40  ;;  %1507 = vrcp.f32 %v932_v49 }
  0xc4   : > { %s2268_s6 = smul.f32 2.0, %s2221_s1  ;;  %s2284_s10 = sld [smem:[#allocation3 + %s723_s13]]  ;;  %1509 = vrcp.f32 %v769_v53 }
  0xc5   : > { %s741_s12 = smul.f32 2.0, %s2230_s17  ;;  %v920_v50 = vadd.f32 %v919_v47, %v915_v43  ;;  %s2295_s25 = sld [smem:[#allocation3 + %s725_s16]] }
  0xc6   : > { %s2674_s3 = smul.f32 2.0, %s2243_s21 }
  0xc7   : > { %s738_s8 = smul.f32 2.0, %s2250_s14  ;;  %v2307_v51 = vadd.f32 %v920_v50, %v916_v46 }
  0xc8   : > { %s2282_s18 = smul.f32 %s2674_s3, %s2243_s21 }
  0xc9   : > { %s2287_s2 = smul.f32 %s738_s8, %s2250_s14  ;;  %1511 = vrsqrt.f32 %v2307_v51  ;;  %v2400_v20 = vstv %s2272_s29  ;;  %vm924_vm3 = vcmp.eq.f32.partialorder %v2307_v51, inf  ;;  %s2725_s29 = sadd.s32 4, %s2204_s15  ;;  %vm926_vm4 = vcmp.eq.f32.partialorder %v2307_v51, 0.0 }
  0xca   : > { %s737_s1 = ssub.f32 1.0, %s2282_s18  ;;  %s2293_s28 = smul.f32 %s741_s12, %s2243_s21  ;;  %v1504_v52 = vpop.eup %1503  ;;  %v927_v29 = vand.u32 2147483648, %v2307_v51 }
  0xcb   : > { %s2299_s24 = smul.f32 %s2268_s6, %s2250_s14  ;;  %v805_v58 = vsub.f32 %v2318_v55, %v1504_v52  ;;  %v2417_v27 = vstv %s2295_s25  ;;  %v2460_v52 = vsub.f32 %v903_v34, %v2430_v33  ;;  %s2726_s25 = sadd.s32 5, %s2204_s15 }
  0xcc   : > { %s2302_s13 = ssub.f32 %s737_s1, %s2287_s2  ;;  %s2305_s5 = smul.f32 %s738_s8, %s2230_s17 }
  0xcd   : > { %s745_s30 = ssub.f32 %s2293_s28, %s2299_s24  ;;  %s2313_s3 = smul.f32 %s2268_s6, %s2243_s21  ;;  %v1506_v56 = vpop.eup %1505  ;;  %v806_v60 = vmul.f32 %v805_v58, %v805_v58  ;;  %v904_v58 = vld [vmem:[%s2189_s27 + $0x18] sm:$0xff] }
  0xce   : > { %s750_s16 = smul.f32 %s741_s12, %s2230_s17  ;;  %v793_v59 = vmul.f32 %v1506_v56, %v2233_v25  ;;  %v2353_v3 = vstv %s2302_s13  ;;  %s2721_s26 = sadd.f32 %s2299_s24, %s2293_s28 }
  0xcf   : > { %s2719_s1 = smul.f32 2.0, %s2243_s21  ;;  %s756_s21 = ssub.f32 %s2305_s5, %s2313_s3  ;;  %v875_v63 = vsel %vm871_vm2, %v806_v60, 0.0  ;;  %v2358_v4 = vstv %s745_s30  ;;  %v808_v11 = vmul.f32 %v2353_v3, %v2192_v0  ;;  %v937_v35 = vmul.f32 %v2208_v15, %v2353_v3 }
  0xd0   : > { %s751_s12 = ssub.f32 1.0, %s750_s16  ;;  %s2340_s8 = smul.f32 %s2268_s6, %s2230_s17  ;;  %v795_v61 = vsel %vm794_vm0, %v2233_v25, %v793_v59  ;;  %v2373_v7 = vstv %s2721_s26  ;;  %v810_v12 = vmul.f32 %v2358_v4, %v2195_v1  ;;  %v938_v43 = vmul.f32 %v2213_v17, %v2358_v4 }
  0xd1   : > { %s2333_s23 = smul.f32 %s2719_s1, %s2250_s14  ;;  %v798_v62 = vsel %vm796_vm1, %v797_v57, %v795_v61  ;;  %v2360_v6 = vstv %s756_s21  ;;  %s2720_s6 = sshll.u32 %s2153_s11, 6  ;;  %v818_v21 = vmul.f32 %v2373_v7, %v2192_v0  ;;  %v943_v49 = vmul.f32 %v2208_v15, %v2373_v7  ;;  %v2477_v57 = vld [vmem:[%s2189_s27 + $0x8] sm:$0xff] }
  0xd2   : > { %s752_s14 = ssub.f32 %s751_s12, %s2287_s2  ;;  %v799_v2 = vmul.f32 %v798_v62, %v2318_v55  ;;  %s2364_s2 = scalar_lea.vmem [#allocation19], %s2720_s6  ;;  %v828_v9 = vmul.f32 %v2360_v6, %v2192_v0  ;;  %v1508_v0 = vpop.eup %1507  ;;  %v949_v36 = vmul.f32 %v2208_v15, %v2360_v6  ;;  %v939_v60 = vadd.f32 %v938_v43, %v937_v35 }
  0xd3   : > { %s755_s17 = ssub.f32 %s2333_s23, %s2340_s8  ;;  %1357 = vst [vmem:[%s2364_s2 + $0x8] sm:$0xff] %v875_v63  ;;  %s1353_s30 = sshll.u32 %s2262_s4, 3  ;;  %v1510_v30 = vpop.eup %1509  ;;  %v989_v35 = vmul.f32 %v2460_v52, %v2460_v52  ;;  %v1859_v55 = vmov 0.0  }
  0xd4   : > { %s757_s16 = sadd.f32 %s2340_s8, %s2333_s23  ;;  %v2375_v8 = vstv %s752_s14  ;;  %v874_v10 = vsel %vm871_vm2, %v799_v2, 0.0  ;;  %1382 = vpush %v1510_v30  ;;  %s1372_s27 = sshll.u32 %s2718_s22, 10 }
  0xd5   : > { %s758_s1 = ssub.f32 %s751_s12, %s2282_s18  ;;  %1034 = vst [vmem:[%s2364_s2] sm:$0xff] %v874_v10  ;;  %v820_v22 = vmul.f32 %v2375_v8, %v2195_v1  ;;  %v2414_v24 = vstv %s755_s17  ;;  %v944_v50 = vmul.f32 %v2213_v17, %v2375_v8  ;;  %s1064_s21 = sshll.u32 %s2364_s2, 4  ;;  %s2592_s21 = int_to_ptr.vmem [resolvable:$true] %s1064_s21 }
  0xd6   : > { %s2383_s13 = sld [smem:[#allocation7 + %s2204_s15]]  ;;  %v2389_v13 = vstv %s757_s16  ;;  %v1512_v39 = vpop.eup %1511  ;;  %v823_v41 = vmul.f32 %v2414_v24, %v2199_v5  ;;  %v946_v2 = vmul.f32 %v2216_v18, %v2414_v24  ;;  %s1860_s22 = smov [#allocation19]  }
  0xd7   : > { %s2722_s24 = sadd.f32 %s2313_s3, %s2305_s5  ;;  %v830_v16 = vmul.f32 %v2389_v13, %v2195_v1  ;;  %v832_v19 = vstv %s758_s1  ;;  %s2724_s3 = sadd.s32 3, %s2204_s15  ;;  %v811_v1 = vadd.f32 %v810_v12, %v808_v11  ;;  %v950_v37 = vmul.f32 %v2213_v17, %v2389_v13 }
  0xd8   : > { %v833_v23 = vmul.f32 %v832_v19, %v2199_v5  ;;  %s2723_s18 = sld [smem:[#allocation41_spill]]  ;;  %v821_v40 = vadd.f32 %v820_v22, %v818_v21  ;;  %v952_v44 = vmul.f32 %v2216_v18, %v832_v19  ;;  %v923_v46 = vmul.f32 %v1512_v39, %v2307_v51  ;;  %s1050_s1 = scalar_lea.sflag [#allocation5], %s2153_s11 }
  0xd9   : > { %v2395_v14 = vstv %s2722_s24  ;;  %s2412_s8 = sld [smem:[#allocation7 + %s2724_s3]]  ;;  %v831_v25 = vadd.f32 %v830_v16, %v828_v9  ;;  %v951_v48 = vadd.f32 %v950_v37, %v949_v36  ;;  %v967_v9 = vmul.f32 %v2236_v26, %v2360_v6 }
  0xda   : > { %s2422_s26 = sld [smem:[#allocation7 + %s2725_s29]]  ;;  %v813_v28 = vmul.f32 %v2395_v14, %v2199_v5  ;;  %v2453_v5 = vstv %s2284_s10  ;;  %v925_v56 = vsel %vm924_vm3, %v2307_v51, %v923_v46  ;;  %v940_v15 = vmul.f32 %v2216_v18, %v2395_v14  ;;  %s2727_s10 = sadd.s32 6, %s2204_s15  ;;  %v783_v46 = vld [vmem:[%s2173_s9 + $0x8] sm:$0xff]  ;;  %vm2569_vm3 = vmxor %vm1019_vm5, %vm1858_vm12 }
  0xdb   : > { %v834_v32 = vadd.f32 %v833_v23, %v831_v25  ;;  %s2464_s23 = sld [smem:[#allocation7 + %s2726_s25]]  ;;  %v824_v17 = vadd.f32 %v823_v41, %v821_v40  ;;  %v928_v59 = vsel %vm926_vm4, %v927_v29, %v925_v56  ;;  %v953_v61 = vadd.f32 %v952_v44, %v951_v48  ;;  %v782_v44 = vld [vmem:[%s2173_s9] sm:$0xff] }
  0xdc   : > { %p760_p2 = scmp.eq.f32.partialorder %s2383_s13, 0.0  ;;  %v814_v53 = vadd.f32 %v813_v28, %v811_v1  ;;  %s2474_s12 = sld [smem:[#allocation7 + %s2727_s10]]  ;;  %v945_v10 = vadd.f32 %v944_v50, %v943_v49  ;;  %v968_v51 = vmul.f32 %v2254_v31, %v2389_v13  ;;  %v970_v12 = vmul.f32 %v2265_v38, %v832_v19 }
  0xdd   : > { %v2447_v45 = vadd.f32 %v2417_v27, %v834_v32  ;;  %v2492_v11 = vadd.f32 %v953_v61, %v2417_v27  ;;  %v955_v16 = vmul.f32 %v2236_v26, %v2353_v3  ;;  %v956_v18 = vmul.f32 %v2254_v31, %v2358_v4  ;;  %s2733_s6 = sld [smem:[#allocation43_spill]]  ;;  %s1749_s13 = sshll.u32 %s1860_s22, 4  ;;  %s1750_s13 = int_to_ptr.vmem [resolvable:$false] %s1749_s13 }
  0xde   : > { %s719_s5 = scalar_lea.vmem %s2723_s18, %s1353_s30  ;;  %v2502_v6 = vsub.f32 %v904_v58, %v2477_v57  ;;  %v961_v13 = vmul.f32 %v2236_v26, %v2373_v7  ;;  %v962_v3 = vmul.f32 %v2254_v31, %v2375_v8  ;;  %v969_v4 = vadd.f32 %v968_v51, %v967_v9  ;;  %s1745_s30 = scalar_lea.vmem %s2592_s21, 1024 }
  0xdf   : > { %v2441_v42 = vld [vmem:[%s719_s5] sm:$0xff]  ;;  %1513 = vrcp.f32 %v2447_v45  ;;  %v816_v19 = vadd.f32 %v2400_v20, %v814_v53  ;;  %v826_v22 = vadd.f32 %v2453_v5, %v824_v17  ;;  %v838_v23 = vstv %s2412_s8  ;;  %p1746_p9 = scmp.ne.s32.totalorder %s2592_s21, %s1745_s30  ;;  %s1751_s24 = scalar_lea.vmem %s1750_s13, 2048 }
  0xe0   : > { %v935_v47 = vsub.f32 %v2441_v42, %v1508_v0  ;;  %v929_v62 = vmul.f32 %v928_v59, %v2441_v42  ;;  %s763_s15 = scalar_select %p760_p2, %s2412_s8, %s2422_s26  ;;  %1515 = vrcp.f32 %v2492_v11  ;;  %v941_v26 = vadd.f32 %v940_v15, %v939_v60 }
  0xe1   : > { %v947_v7 = vadd.f32 %v946_v2, %v945_v10  ;;  %v971_v1 = vadd.f32 %v970_v12, %v969_v4  ;;  %s2747_s26 = smov (!%p760_p2, %s2422_s26), %s2464_s23  ;;  %v957_v31 = vadd.f32 %v956_v18, %v955_v16  ;;  %v958_v8 = vmul.f32 %v2265_v38, %v2395_v14  ;;  %p1747_p11 = pnand %p1746_p9, %p2052_p4 }
  0xe2   : > { %v936_v63 = vmul.f32 %v935_v47, %v935_v47  ;;  %v1022_v21 = vsel %vm1019_vm5, %v929_v62, 0.0  ;;  %v843_v0 = vstv %s763_s15  ;;  %s2749_s23 = smov (!%p760_p2, %s2464_s23), %s2474_s12  ;;  %v963_v28 = vadd.f32 %v962_v3, %v961_v13  ;;  %p1752_p10 = scmp.lt.s32.totalorder %s2592_s21, %s1750_s13 }
  0xe3   : > { %1358 = vst [vmem:[%s2364_s2 + $0x10] sm:$0xff] %v1022_v21  ;;  %v964_v29 = vmul.f32 %v2265_v38, %v2414_v24  ;;  %v2531_v30 = vadd.f32 %v971_v1, %v2417_v27  ;;  %v839_v32 = vmul.f32 %v838_v23, %v816_v19  ;;  %v844_v34 = vmul.f32 %v843_v0, %v826_v22  ;;  %s2590_s16 = scalar_lea.hbm %s2733_s6, %s1372_s27  ;;  %p1748_p1 = pneg %p1747_p11 }
  0xe4   : > { %v1023_v25 = vsel %vm1019_vm5, %v936_v63, 0.0  ;;  %v942_v36 = vadd.f32 %v941_v26, %v2400_v20  ;;  %v948_v37 = vadd.f32 %v947_v7, %v2453_v5  ;;  %v990_v14 = vmul.f32 %v2502_v6, %v2502_v6  ;;  %p1753_p3 = scmp.lt.s32.totalorder %s1751_s24, %s1745_s30 }
  0xe5   : > { %1359 = vst [vmem:[%s2364_s2 + $0x18] sm:$0xff] %v1023_v25  ;;  %1517 = vrcp.f32 %v2531_v30  ;;  %v841_v24 = vstv %s2747_s26  ;;  %v846_v39 = vstv %s2749_s23  ;;  %v959_v27 = vadd.f32 %v958_v8, %v957_v31 }
  0xe6   : > { %v965_v40 = vadd.f32 %v964_v29, %v963_v28  ;;  %v975_v47 = vmul.f32 %v942_v36, %v838_v23  ;;  %v978_v48 = vmul.f32 %v948_v37, %v843_v0  ;;  %v991_v49 = vadd.f32 %v990_v14, %v989_v35  ;;  %p1754_p12 = por %p1753_p3, %p1752_p10 }
  0xe7   : > { %v960_v56 = vadd.f32 %v959_v27, %v2400_v20  ;;  %vm1008_vm7 = vcmp.ne.f32.partialorder %v2441_v42, 0.0  ;;  %vm1009_vm8 = vcmp.lt.f32.partialorder %v2492_v11, 0.1  ;;  %vm861_vm10 = vcmp.lt.f32.partialorder %v2447_v45, 0.1 }
  0xe8   : > { %v966_v15 = vadd.f32 %v965_v40, %v2453_v5  ;;  %1519 = vrsqrt.f32 %v991_v49  ;;  %vm1010_vm14 = vmor %vm1008_vm7, %vm1009_vm8  ;;  %vm865_vm0 = vcmp.gt.f32.partialorder %v2447_v45, 1000.0  ;;  %vm1013_vm8 = vcmp.gt.f32.partialorder %v2492_v11, 1000.0  ;;  %p1755_p8 = pnand %p1754_p12, %p1748_p1 }
  0xe9   : > { %v981_v10 = vmul.f32 %v960_v56, %v838_v23  ;;  %vm862_vm15 = vmor %vm860_vm6, %vm861_vm10  ;;  %vm1015_vm10 = vcmp.lt.f32.partialorder %v2531_v30, 0.1  ;;  %vm1017_vm5 = vcmp.gt.f32.partialorder %v2531_v30, 1000.0 }
  0xea   : > { %v984_v51 = vmul.f32 %v966_v15, %v843_v0 }
  0xec   : > { %v1514_v38 = vpop.eup %1513 }
  0xed   : > { %v840_v41 = vmul.f32 %v1514_v38, %v839_v32  ;;  %v845_v43 = vmul.f32 %v1514_v38, %v844_v34  ;;  %v1516_v17 = vpop.eup %1515 }
  0xee   : > { %v976_v60 = vmul.f32 %v1516_v17, %v975_v47  ;;  %v979_v61 = vmul.f32 %v1516_v17, %v978_v48 }
  0xef   : > { %v842_v50 = vadd.f32 %v841_v24, %v840_v41  ;;  %v847_v53 = vadd.f32 %v846_v39, %v845_v43 }
  0xf0   : > { %v977_v2 = vadd.f32 %v976_v60, %v841_v24  ;;  %v980_v9 = vadd.f32 %v979_v61, %v846_v39 }
  0xf1   : > { %v848_v58 = vsub.f32 %v782_v44, %v842_v50  ;;  %v850_v59 = vsub.f32 %v783_v46, %v847_v53 }
  0xf2   : > { %v993_v16 = vsub.f32 %v977_v2, %v2430_v33  ;;  %v995_v18 = vsub.f32 %v980_v9, %v2477_v57  ;;  %v1518_v20 = vpop.eup %1517 }
  0xf3   : > { %v849_v62 = vmul.f32 %v848_v58, %v848_v58  ;;  %v851_v63 = vmul.f32 %v850_v59, %v850_v59  ;;  %v982_v5 = vmul.f32 %v1518_v20, %v981_v10  ;;  %v985_v21 = vmul.f32 %v1518_v20, %v984_v51 }
  0xf4   : > { %v994_v13 = vmul.f32 %v993_v16, %v2502_v6  ;;  %v996_v3 = vmul.f32 %v995_v18, %v2460_v52 }
  0xf5   : > { %v852_v12 = vadd.f32 %v851_v63, %v849_v62  ;;  %v983_v4 = vadd.f32 %v982_v5, %v841_v24  ;;  %v986_v19 = vadd.f32 %v985_v21, %v846_v39  ;;  %v1520_v1 = vpop.eup %1519 }
  0xf6   : > { %v997_v22 = vsub.f32 %v994_v13, %v996_v3 }
  0xf7   : > { %1521 = vrsqrt.f32 %v852_v12  ;;  %v1000_v25 = vsub.f32 %v983_v4, %v2430_v33  ;;  %v1002_v23 = vsub.f32 %v986_v19, %v2477_v57  ;;  %vm855_vm9 = vcmp.eq.f32.partialorder %v852_v12, inf }
  0xf8   : > { %v998_v0 = vand.u32 2147483647, %v997_v22  ;;  %v858_v33 = vand.u32 2147483648, %v852_v12  ;;  %vm857_vm11 = vcmp.eq.f32.partialorder %v852_v12, 0.0 }
  0xf9   : > { %v1001_v26 = vmul.f32 %v1000_v25, %v2502_v6  ;;  %v1003_v7 = vmul.f32 %v1002_v23, %v2460_v52  ;;  %v2728_v52 = vmov 0 }
  0xfa   : > { %v999_v8 = vmul.f32 %v1520_v1, %v998_v0  ;;  %v2729_v52 = vsel %vm2559_vm13, 4294967295, %v2728_v52 }
  0xfb   : > { %v1004_v31 = vsub.f32 %v1001_v26, %v1003_v7  ;;  %vm2732_vm6 = vnez %v2729_v52 }
  0xfd   : > { %v1005_v28 = vand.u32 2147483647, %v1004_v31 }
  0xff   : > { %v1006_v57 = vmul.f32 %v1520_v1, %v1005_v28 }
 0x101   : > { %v1007_v6 = vadd.f32 %v1006_v57, %v999_v8 }
 0x103   : > { %vm1011_vm1 = vcmp.gt.f32.partialorder %v1007_v6, 1000.0 }
 0x104   : > { %v1522_v29 = vpop.eup %1521  ;;  %vm1012_vm4 = vmor %vm1010_vm14, %vm1011_vm1 }
 0x105   : > { %v854_v32 = vmul.f32 %v1522_v29, %v852_v12  ;;  %s1383_s9 = spop %1382 }
 0x106   : > { %v880_v36 = vstv %s1383_s9 }
 0x107   : > { %v856_v42 = vsel %vm855_vm9, %v852_v12, %v854_v32 }
 0x108   : > { %v859_v34 = vsel %vm857_vm11, %v858_v33, %v856_v42 }
 0x109   : > { %vm863_vm2 = vcmp.gt.f32.partialorder %v859_v34, 1000.0 }
 0x10a   : > { %vm864_vm13 = vmor %vm862_vm15, %vm863_vm2 }
 0x10b   : > { %vm866_vm7 = vmor %vm864_vm13, %vm865_vm0 }
 0x10c   : > { %vm873_vm9 = vmor %vm866_vm7, %vm2732_vm6 }
 0x10d   : > { %vm876_vm11 = vmxor %vm873_vm9, %vm1858_vm12  ;;  %v879_v54 = vsel %vm873_vm9, 0.0, %v859_v34 }
 0x10e   : > { %v1355_v45 = vsel %vm876_vm11, 1.0, %v1859_v55  ;;  %vm1014_vm13 = vmor %vm1012_vm4, %vm1013_vm8  ;;  %v881_v11 = vmul.f32 %v880_v36, %v879_v54 }
 0x10f   : > { %vm1016_vm14 = vmor %vm1014_vm13, %vm1015_vm10  ;;  %1361 = vst [vmem:[%s2364_s2 + $0x28] sm:$0xff] %v1355_v45 }
 0x110   : > { %vm1018_vm15 = vmor %vm1016_vm14, %vm1017_vm5  ;;  %1523 = vtanh.f32 %v881_v11 }
 0x111   : > { %vm1021_vm0 = vmor %vm1018_vm15, %vm2569_vm3 }
 0x112   : > { %vm1024_vm1 = vmxor %vm1021_vm0, %vm1858_vm12  ;;  %v1027_v30 = vsel %vm1021_vm0, 0.0, %v1007_v6 }
 0x113   : > { %v1356_v37 = vsel %vm1024_vm1, 1.0, %v1859_v55  ;;  %v1028_v14 = vmul.f32 %v1027_v30, %v880_v36 }
 0x114   : > { %1363 = vst [vmem:[%s2364_s2 + $0x38] sm:$0xff] %v1356_v37 }
 0x115   : > { %1525 = vtanh.f32 %v1028_v14 }
 0x11d   : > { %v1524_v38 = vpop.eup %1523 }
 0x11e   : > { %1360 = vst [vmem:[%s2364_s2 + $0x20] sm:$0xff] %v1524_v38 }
 0x122   : > { %v1526_v24 = vpop.eup %1525 }
 0x123   : > { %1362 = vst [vmem:[%s2364_s2 + $0x30] sm:$0xff] %v1526_v24 }
 0x124   : > { %1758 = shalt.err (!%p1755_p8)
}
 0x125   : > { %s1759_s2 = scalar_lea.hbm %s2590_s16, 1024  ;;  %s1763_s18 = scalar_lea.hbm %s2733_s6, 2048 }
 0x126   : > { %p1760_p13 = scmp.ne.s32.totalorder %s2590_s16, %s1759_s2  ;;  %p1764_p7 = scmp.lt.s32.totalorder %s2590_s16, %s2733_s6 }
 0x127   : > { %p1765_p2 = scmp.lt.s32.totalorder %s1763_s18, %s1759_s2 }
 0x128   : > { %p1761_p0 = pnand %p1760_p13, %p2052_p4 }
 0x129   : > { %p1766_p9 = por %p1765_p2, %p1764_p7 }
 0x12a   : > { %p1762_p6 = pneg %p1761_p0 }
 0x12c   : > { %p1767_p11 = pnand %p1766_p9, %p1762_p6 }
 0x12e   : > { %1770 = shalt.err (!%p1767_p11)
}
 0x12f   : > { %s1861_s8 = smov 128   ;;  %s1862_s29 = smov 8  }
 0x130   : > { %1406 = dma.vmem_to_hbm [thread:$0]  (%p2052_p4), %s2592_s21, 1024, %s2590_s16, %s1050_s1, %s1861_s8, %s1861_s8, %s1862_s29  }
 0x131 PF: > { %s2735_s25 = sld [smem:[#allocation29_spill]]  ;;  %s1079_s23 = sand.u32 1, %s1825_s19  }
 0x132   : > { %s1080_s10 = scalar_lea.sflag [#allocation5], %s1079_s23 }
 0x137   : > { %p2736_p1 = scmp.ge.s32.totalorder %s2735_s25, 2 }
 0x139   : > { %p1438_p10 = pnand %p2736_p1, %p2056_p5 }
 0x13b   : > { %p1439_p3 = pneg %p1438_p10 }
 0x13d   : > { %1820 = dma.done.wait (%p1439_p3), %s1080_s10, 1024  }
 0x13e   : > { %1822 = vsyncadd (%p1439_p3), %s1080_s10, 4294966272  ;;  %s39_s23 = sadd.s32 1, %s2735_s25   ;;  %s2737_s12 = sld [smem:[#allocation27_spill]] }
 0x13f   : > { %p36_p12 = scmp.ge.s32.totalorder %s39_s23, 4   ;;  %s2738_s21 = sld [smem:[#allocation31_spill]] }
 0x140   : > { %s2739_s7 = sld [smem:[#allocation30_spill]]  ;;  %s2740_s19 = smov %s1829_s20 }
 0x141   : > { %s2742_s22 = smov %s1841_s0 }
 0x142   :  { %38 = sbr.rel (!%p36_p12) target bundleno = 27 (0x1b), region = 200 }
 0x144   : > { %s2741_s20 = smov %s2737_s12 }
 0x146   : > { %s2743_s0 = smov %s2739_s7 }
 0x147   :  { %1085 = vsyncpa [#allocation4], 1 }
 0x148   :  { %1087 = vsyncpa [#allocation4 + $0x1], 1 }
 0x149   :  { %1088 = vsyncpa [#allocation11], 1 }
 0x14a   :  { %1090 = vsyncpa [#allocation11 + $0x1], 1 }
 0x14b   :  { %1091 = vsyncpa [#allocation14], 1 }
 0x14c   :  { %1093 = vsyncpa [#allocation14 + $0x1], 1 }
 0x14d   :  { %1094 = vsyncpa [#allocation17], 1 }
 0x14e   :  { %1096 = vsyncpa [#allocation17 + $0x1], 1 }
 0x14f   :  { %1097 = vsyncpa [#allocation5], 1 }
 0x150   :  { %1099 = vsyncpa [#allocation5 + $0x1], 1 }
 0x151   :  { %1100 = vsyncpa [#allocation6], 1 }
 0x152   :  { %1102 = vsyncpa [#allocation6 + $0x1], 1 }
 0x153   :  { %1103 = vsyncpa [#allocation8], 1 }

</bundles_post_ra>
